<compile_context>
chip_gen: v7x
topology: tpu7x:2x2x1
jax: 0.10.0
libtpu: 0.0.40
codegen_flags: <defaults>
</compile_context>

<pallas_src>
import functools

import jax
import jax.numpy as jnp
from jax import lax
from jax.experimental import pallas as pl
from jax.experimental.pallas import tpu as pltpu


def _round_up(x, m):
    return ((x + m - 1) // m) * m


def _attn_prop_kernel(
    d1_ref, d2_ref, wv_ref,
    wq_ref, bq_ref, wk_ref, bk_ref, wvf_ref, bvf_ref,
    wm_ref, bm_ref,
    w1t_ref, w1b_ref, b1_ref, bn_s_ref, bn_b_ref, w2_ref, b2_ref,
    out_ref,
    acc_ref,
    *, head: int, head_dim: int, compute_dtype,
):
    f32 = jnp.float32
    d1 = d1_ref[...]            # [TN, C] compute dtype
    d2 = d2_ref[...]            # [M,  C] compute dtype
    wv = wv_ref[...]            # [M,  1] f32

    scale = 1.0 / (float(head_dim) ** 0.5)

    # 1x1 convs == matmuls with full K=C contraction (good MXU shape).
    q = jnp.dot(d1, wq_ref[...], preferred_element_type=f32) + bq_ref[...]    # [TN, C]
    k = jnp.dot(d2, wk_ref[...], preferred_element_type=f32) + bk_ref[...]    # [M,  C]
    v = jnp.dot(d2, wvf_ref[...], preferred_element_type=f32) + bvf_ref[...]  # [M,  C]
    q = q * scale          # fold 1/sqrt(head_dim) into q once
    v = v * wv             # weight_v scaling of values

    q_c = q.astype(compute_dtype)
    k_c = k.astype(compute_dtype)
    v_c = v.astype(compute_dtype)

    # Contract last dim of both operands -> no explicit transpose of k.
    dnums = (((1,), (1,)), ((), ()))

    for h in range(head):
        lo = h * head_dim
        hi = lo + head_dim
        s = lax.dot_general(q_c[:, lo:hi], k_c[:, lo:hi], dnums,
                            preferred_element_type=f32)                # [TN, M] f32
        s = s - jnp.max(s, axis=-1, keepdims=True)
        p = jnp.exp(s)                                                 # f32 (EUP)
        denom = jnp.sum(p, axis=-1, keepdims=True)                     # [TN, 1]
        o = jnp.dot(p.astype(compute_dtype), v_c[:, lo:hi],
                    preferred_element_type=f32)                        # [TN, hd]
        # Normalize after the PV matmul (TN*hd muls instead of TN*M).
        acc_ref[:, lo:hi] = o * (1.0 / denom)

    add_value = acc_ref[...]                                           # [TN, C] f32

    # mh_filter: single matmul with K = C (heads already laid out in scratch).
    add_value = (jnp.dot(add_value.astype(compute_dtype), wm_ref[...],
                         preferred_element_type=f32) + bm_ref[...])

    # cat_filter without lane-axis concat: hdn = d1 @ W1_top + add_value @ W1_bot.
    hdn = (jnp.dot(d1, w1t_ref[...], preferred_element_type=f32)
           + jnp.dot(add_value.astype(compute_dtype), w1b_ref[...],
                     preferred_element_type=f32)
           + b1_ref[...])                                              # [TN, 2C]
    hdn = hdn * bn_s_ref[...] + bn_b_ref[...]   # eval-mode SyncBatchNorm (folded affine)
    hdn = jnp.maximum(hdn, 0.0)
    hdn = (jnp.dot(hdn.astype(compute_dtype), w2_ref[...],
                   preferred_element_type=f32) + b2_ref[...])          # [TN, C]

    out_ref[...] = d1.astype(f32) + hdn


def attention_propagation(desc1, desc2, params, weight_v=None, *, head,
                          compute_dtype=jnp.bfloat16, tile_n=None,
                          vmem_limit_bytes=48 * 1024 * 1024):
    """desc1: [B, C, N], desc2: [B, C, M], weight_v: [B, M] or None (PyTorch NCL)."""
    B, C, N = desc1.shape
    M = desc2.shape[2]
    assert C % head == 0
    head_dim = C // head

    # Wrapper glue: cast first (halves transpose traffic), then NCL -> NLC.
    # TODO(synk): fuse these boundary transposes into the kernel (NCL blocks) to
    # remove ~2 extra HBM round trips of desc1/desc2/out at production sizes.
    d1 = jnp.transpose(desc1.astype(compute_dtype), (0, 2, 1))   # [B, N, C]
    d2 = jnp.transpose(desc2.astype(compute_dtype), (0, 2, 1))   # [B, M, C]
    if weight_v is None:
        wv = jnp.ones((B, M, 1), jnp.float32)
    else:
        wv = weight_v.reshape(B, M, 1).astype(jnp.float32)

    (wq, bq, wk, bk, wvf, bvf, wm, bm, w1, b1, bn_s, bn_b, w2, b2) = params
    w1t, w1b = w1[:C, :], w1[C:, :]     # split W1 -> no [TN,2C] concat in-kernel

    cast = lambda a: a.astype(compute_dtype)
    wq_c, wk_c, wvf_c, wm_c, w1t_c, w1b_c, w2_c = map(
        cast, (wq, wk, wvf, wm, w1t, w1b, w2))
    asf32 = lambda a: a.astype(jnp.float32)
    bq, bk, bvf, bm, b1, bn_s, bn_b, b2 = map(
        asf32, (bq, bk, bvf, bm, b1, bn_s, bn_b, b2))

    # N tiling: bound live VMEM to TN*M scores and give the pipeline a second
    # (parallel) grid axis. TN budgeted conservatively for v7x's 64 MiB VMEM.
    if tile_n is None:
        tile_n = min(128, _round_up(N, 8))
    tile_n = min(_round_up(tile_n, 8), _round_up(N, 8))
    n_pad = _round_up(N, tile_n)
    if n_pad != N:
        d1 = jnp.pad(d1, ((0, 0), (0, n_pad - N), (0, 0)))
    n_tiles = n_pad // tile_n

    kernel = functools.partial(_attn_prop_kernel, head=head,
                               head_dim=head_dim, compute_dtype=compute_dtype)

    def const2(b, n):
        return (0, 0)

    grid_spec = pltpu.PrefetchScalarGridSpec(
        num_scalar_prefetch=0,
        grid=(B, n_tiles),
        in_specs=[
            pl.BlockSpec((None, tile_n, C), lambda b, n: (b, n, 0)),   # desc1 tile
            pl.BlockSpec((None, M, C),      lambda b, n: (b, 0, 0)),   # desc2 (resident over n)
            pl.BlockSpec((None, M, 1),      lambda b, n: (b, 0, 0)),   # weight_v
            pl.BlockSpec((C, C), const2), pl.BlockSpec((1, C), const2),        # query
            pl.BlockSpec((C, C), const2), pl.BlockSpec((1, C), const2),        # key
            pl.BlockSpec((C, C), const2), pl.BlockSpec((1, C), const2),        # value
            pl.BlockSpec((C, C), const2), pl.BlockSpec((1, C), const2),        # mh
            pl.BlockSpec((C, 2 * C), const2), pl.BlockSpec((C, 2 * C), const2),  # W1 top/bot
            pl.BlockSpec((1, 2 * C), const2),                                    # b1
            pl.BlockSpec((1, 2 * C), const2), pl.BlockSpec((1, 2 * C), const2),  # BN scale/shift
            pl.BlockSpec((2 * C, C), const2), pl.BlockSpec((1, C), const2),      # cat conv2
        ],
        out_specs=pl.BlockSpec((None, tile_n, C), lambda b, n: (b, n, 0)),
        scratch_shapes=[pltpu.VMEM((tile_n, C), jnp.float32)],   # per-head accumulator
    )

    out = pl.pallas_call(
        kernel,
        out_shape=jax.ShapeDtypeStruct((B, n_pad, C), jnp.float32),
        grid_spec=grid_spec,
        compiler_params=pltpu.CompilerParams(
            dimension_semantics=("parallel", "parallel"),
            vmem_limit_bytes=vmem_limit_bytes,
        ),
    )(d1, d2, wv,
      wq_c, bq, wk_c, bk, wvf_c, bvf, wm_c, bm,
      w1t_c, w1b_c, b1, bn_s, bn_b, w2_c, b2)

    out = out[:, :N, :]
    # Back to PyTorch NCL layout.
    return jnp.transpose(out, (0, 2, 1))


def make_params(key, channel):
    """Deterministic parameter init. Matmul weights stored as [C_in, C_out]."""
    C = channel
    ks = jax.random.split(key, 12)
    s = 0.1
    wq = s * jax.random.normal(ks[0], (C, C), jnp.float32)
    bq = s * jax.random.normal(ks[1], (1, C), jnp.float32)
    wk = s * jax.random.normal(ks[2], (C, C), jnp.float32)
    bk = s * jax.random.normal(ks[3], (1, C), jnp.float32)
    wv = s * jax.random.normal(ks[4], (C, C), jnp.float32)
    bv = s * jax.random.normal(ks[5], (1, C), jnp.float32)
    wm = s * jax.random.normal(ks[6], (C, C), jnp.float32)
    bm = s * jax.random.normal(ks[7], (1, C), jnp.float32)
    w1 = s * jax.random.normal(ks[8], (2 * C, 2 * C), jnp.float32)
    b1 = s * jax.random.normal(ks[9], (1, 2 * C), jnp.float32)
    w2 = s * jax.random.normal(ks[10], (2 * C, C), jnp.float32)
    b2 = s * jax.random.normal(ks[11], (1, C), jnp.float32)
    # SyncBatchNorm (eval mode) folded into a per-channel affine.
    gamma = jnp.ones((1, 2 * C), jnp.float32)
    beta = jnp.zeros((1, 2 * C), jnp.float32)
    running_mean = 0.05 * jnp.arange(2 * C, dtype=jnp.float32).reshape(1, 2 * C)
    running_var = 1.0 + 0.01 * jnp.arange(2 * C, dtype=jnp.float32).reshape(1, 2 * C)
    eps = 1e-5
    bn_s = gamma / jnp.sqrt(running_var + eps)
    bn_b = beta - running_mean * bn_s
    return (wq, bq, wk, bk, wv, bv, wm, bm, w1, b1, bn_s, bn_b, w2, b2)


def _reference(desc1, desc2, weight_v, params, head):
    """Pure-JAX f32 reference mirroring the PyTorch forward (intended semantics)."""
    (wq, bq, wk, bk, wvf, bvf, wm, bm, w1, b1, bn_s, bn_b, w2, b2) = params
    B, C, N = desc1.shape
    hd = C // head
    d1 = jnp.transpose(desc1, (0, 2, 1))
    d2 = jnp.transpose(desc2, (0, 2, 1))
    q = d1 @ wq + bq
    k = d2 @ wk + bk
    v = d2 @ wvf + bvf
    v = v * weight_v[:, :, None]
    qh = q.reshape(B, -1, head, hd)
    kh = k.reshape(B, -1, head, hd)
    vh = v.reshape(B, -1, head, hd)
    s = jnp.einsum('bnhd,bmhd->bhnm', qh, kh) / (hd ** 0.5)
    p = jax.nn.softmax(s, axis=-1)
    addv = jnp.einsum('bhnm,bmhd->bnhd', p, vh).reshape(B, -1, C)
    addv = addv @ wm + bm
    cat = jnp.concatenate([d1, addv], axis=-1)
    h = cat @ w1 + b1
    h = jnp.maximum(h * bn_s + bn_b, 0.0)
    h = h @ w2 + b2
    return jnp.transpose(d1 + h, (0, 2, 1))


if __name__ == "__main__":
    B, C, HEAD = 2, 32, 4
    N, M = 8, 16

    key = jax.random.PRNGKey(0)
    k_d1, k_d2, k_wv, k_p = jax.random.split(key, 4)
    desc1 = jax.random.normal(k_d1, (B, C, N), jnp.float32)    # PyTorch NCL
    desc2 = jax.random.normal(k_d2, (B, C, M), jnp.float32)
    weight_v = jax.nn.sigmoid(jax.random.normal(k_wv, (B, M), jnp.float32))
    params = make_params(k_p, C)

    ref = _reference(desc1, desc2, weight_v, params, HEAD)

    # f32 path: tight semantic check.
    out_f32 = attention_propagation(desc1, desc2, params, weight_v, head=HEAD,
                                    compute_dtype=jnp.float32)
    out_f32 = jax.block_until_ready(out_f32)
    assert out_f32.shape == (B, C, N)
    assert jnp.allclose(out_f32, ref, atol=1e-4, rtol=1e-4), "f32 mismatch vs reference"

    # bf16 matmul-operand path (default / production dtype): loose check.
    out_bf16 = attention_propagation(desc1, desc2, params, weight_v, head=HEAD,
                                     compute_dtype=jnp.bfloat16)
    out_bf16 = jax.block_until_ready(out_bf16)
    assert out_bf16.shape == (B, C, N)
    assert jnp.allclose(out_bf16, ref, atol=5e-2, rtol=5e-2), "bf16 mismatch vs reference"

    print("KERNEL_OK")
</pallas_src>

<mosaic_0001>
module attributes {stable_mosaic.version = 11 : i64} {
  func.func @_attn_prop_kernel(%arg0: i32, %arg1: i32, %arg2: memref<1x8x32xf32, #tpu.memory_space<vmem>>, %arg3: memref<1x16x32xf32, #tpu.memory_space<vmem>>, %arg4: memref<1x16x1xf32, #tpu.memory_space<vmem>>, %arg5: memref<32x32xf32, #tpu.memory_space<vmem>>, %arg6: memref<1x32xf32, #tpu.memory_space<vmem>>, %arg7: memref<32x32xf32, #tpu.memory_space<vmem>>, %arg8: memref<1x32xf32, #tpu.memory_space<vmem>>, %arg9: memref<32x32xf32, #tpu.memory_space<vmem>>, %arg10: memref<1x32xf32, #tpu.memory_space<vmem>>, %arg11: memref<32x32xf32, #tpu.memory_space<vmem>>, %arg12: memref<1x32xf32, #tpu.memory_space<vmem>>, %arg13: memref<32x64xf32, #tpu.memory_space<vmem>>, %arg14: memref<32x64xf32, #tpu.memory_space<vmem>>, %arg15: memref<1x64xf32, #tpu.memory_space<vmem>>, %arg16: memref<1x64xf32, #tpu.memory_space<vmem>>, %arg17: memref<1x64xf32, #tpu.memory_space<vmem>>, %arg18: memref<64x32xf32, #tpu.memory_space<vmem>>, %arg19: memref<1x32xf32, #tpu.memory_space<vmem>>, %arg20: memref<1x8x32xf32, #tpu.memory_space<vmem>>, %arg21: memref<8x32xf32, #tpu.memory_space<vmem>>) attributes {dimension_semantics = [#tpu.dimension_semantics<parallel>, #tpu.dimension_semantics<parallel>], iteration_bounds = array<i64: 2, 1>, scalar_prefetch = 0 : i64, scratch_operands = 1 : i64, tpu.core_type = #tpu.core_type<tc>, window_params = [{transform_indices = @transform_0, window_bounds = array<i64: 1, 8, 32>}, {transform_indices = @transform_1, window_bounds = array<i64: 1, 16, 32>}, {transform_indices = @transform_2, window_bounds = array<i64: 1, 16, 1>}, {pipeline_mode = #tpu.pipeline_mode<synchronous>, transform_indices = @transform_3, window_bounds = array<i64: 32, 32>}, {pipeline_mode = #tpu.pipeline_mode<synchronous>, transform_indices = @transform_4, window_bounds = array<i64: 1, 32>}, {pipeline_mode = #tpu.pipeline_mode<synchronous>, transform_indices = @transform_5, window_bounds = array<i64: 32, 32>}, {pipeline_mode = #tpu.pipeline_mode<synchronous>, transform_indices = @transform_6, window_bounds = array<i64: 1, 32>}, {pipeline_mode = #tpu.pipeline_mode<synchronous>, transform_indices = @transform_7, window_bounds = array<i64: 32, 32>}, {pipeline_mode = #tpu.pipeline_mode<synchronous>, transform_indices = @transform_8, window_bounds = array<i64: 1, 32>}, {pipeline_mode = #tpu.pipeline_mode<synchronous>, transform_indices = @transform_9, window_bounds = array<i64: 32, 32>}, {pipeline_mode = #tpu.pipeline_mode<synchronous>, transform_indices = @transform_10, window_bounds = array<i64: 1, 32>}, {pipeline_mode = #tpu.pipeline_mode<synchronous>, transform_indices = @transform_11, window_bounds = array<i64: 32, 64>}, {pipeline_mode = #tpu.pipeline_mode<synchronous>, transform_indices = @transform_12, window_bounds = array<i64: 32, 64>}, {pipeline_mode = #tpu.pipeline_mode<synchronous>, transform_indices = @transform_13, window_bounds = array<i64: 1, 64>}, {pipeline_mode = #tpu.pipeline_mode<synchronous>, transform_indices = @transform_14, window_bounds = array<i64: 1, 64>}, {pipeline_mode = #tpu.pipeline_mode<synchronous>, transform_indices = @transform_15, window_bounds = array<i64: 1, 64>}, {pipeline_mode = #tpu.pipeline_mode<synchronous>, transform_indices = @transform_16, window_bounds = array<i64: 64, 32>}, {pipeline_mode = #tpu.pipeline_mode<synchronous>, transform_indices = @transform_17, window_bounds = array<i64: 1, 32>}, {transform_indices = @transform_18, window_bounds = array<i64: 1, 8, 32>}]} {
    %c0 = arith.constant 0 : index
    %c0_0 = arith.constant 0 : index
    %c0_1 = arith.constant 0 : index
    %0 = vector.load %arg2[%c0, %c0_0, %c0_1] : memref<1x8x32xf32, #tpu.memory_space<vmem>>, vector<1x8x32xf32>
    %1 = vector.shape_cast %0 : vector<1x8x32xf32> to vector<8x32xf32>
    %c0_2 = arith.constant 0 : index
    %c0_3 = arith.constant 0 : index
    %c0_4 = arith.constant 0 : index
    %2 = vector.load %arg3[%c0_2, %c0_3, %c0_4] : memref<1x16x32xf32, #tpu.memory_space<vmem>>, vector<1x16x32xf32>
    %3 = vector.shape_cast %2 : vector<1x16x32xf32> to vector<16x32xf32>
    %c0_5 = arith.constant 0 : index
    %c0_6 = arith.constant 0 : index
    %c0_7 = arith.constant 0 : index
    %4 = vector.load %arg4[%c0_5, %c0_6, %c0_7] : memref<1x16x1xf32, #tpu.memory_space<vmem>>, vector<1x16x1xf32>
    %5 = vector.shape_cast %4 : vector<1x16x1xf32> to vector<16x1xf32>
    %c0_8 = arith.constant 0 : index
    %c0_9 = arith.constant 0 : index
    %6 = vector.load %arg5[%c0_8, %c0_9] : memref<32x32xf32, #tpu.memory_space<vmem>>, vector<32x32xf32>
    %cst = arith.constant dense<0.000000e+00> : vector<8x32xf32>
    %7 = tpu.matmul %1, %6, %cst {dimension_numbers = #tpu.dot_dimension_numbers<[1], [0], [0], [1], [0, 0, 1, 1], [], []>} : vector<8x32xf32>, vector<32x32xf32>, vector<8x32xf32> -> vector<8x32xf32>
    %c0_10 = arith.constant 0 : index
    %c0_11 = arith.constant 0 : index
    %8 = vector.load %arg6[%c0_10, %c0_11] : memref<1x32xf32, #tpu.memory_space<vmem>>, vector<1x32xf32>
    %9 = vector.broadcast %8 : vector<1x32xf32> to vector<8x32xf32>
    %10 = arith.addf %7, %9 : vector<8x32xf32>
    %c0_12 = arith.constant 0 : index
    %c0_13 = arith.constant 0 : index
    %11 = vector.load %arg7[%c0_12, %c0_13] : memref<32x32xf32, #tpu.memory_space<vmem>>, vector<32x32xf32>
    %cst_14 = arith.constant dense<0.000000e+00> : vector<16x32xf32>
    %12 = tpu.matmul %3, %11, %cst_14 {dimension_numbers = #tpu.dot_dimension_numbers<[1], [0], [0], [1], [0, 0, 1, 1], [], []>} : vector<16x32xf32>, vector<32x32xf32>, vector<16x32xf32> -> vector<16x32xf32>
    %c0_15 = arith.constant 0 : index
    %c0_16 = arith.constant 0 : index
    %13 = vector.load %arg8[%c0_15, %c0_16] : memref<1x32xf32, #tpu.memory_space<vmem>>, vector<1x32xf32>
    %14 = vector.broadcast %13 : vector<1x32xf32> to vector<16x32xf32>
    %15 = arith.addf %12, %14 : vector<16x32xf32>
    %c0_17 = arith.constant 0 : index
    %c0_18 = arith.constant 0 : index
    %16 = vector.load %arg9[%c0_17, %c0_18] : memref<32x32xf32, #tpu.memory_space<vmem>>, vector<32x32xf32>
    %cst_19 = arith.constant dense<0.000000e+00> : vector<16x32xf32>
    %17 = tpu.matmul %3, %16, %cst_19 {dimension_numbers = #tpu.dot_dimension_numbers<[1], [0], [0], [1], [0, 0, 1, 1], [], []>} : vector<16x32xf32>, vector<32x32xf32>, vector<16x32xf32> -> vector<16x32xf32>
    %c0_20 = arith.constant 0 : index
    %c0_21 = arith.constant 0 : index
    %18 = vector.load %arg10[%c0_20, %c0_21] : memref<1x32xf32, #tpu.memory_space<vmem>>, vector<1x32xf32>
    %19 = vector.broadcast %18 : vector<1x32xf32> to vector<16x32xf32>
    %20 = arith.addf %17, %19 : vector<16x32xf32>
    %cst_22 = arith.constant 0.353553385 : f32
    %21 = vector.broadcast %cst_22 : f32 to vector<8x32xf32>
    %22 = arith.mulf %10, %21 : vector<8x32xf32>
    %23 = vector.broadcast %5 : vector<16x1xf32> to vector<16x32xf32>
    %24 = arith.mulf %20, %23 : vector<16x32xf32>
    %25 = vector.extract_strided_slice %22 {offsets = [0, 0], sizes = [8, 8], strides = [1, 1]} : vector<8x32xf32> to vector<8x8xf32>
    %26 = vector.extract_strided_slice %15 {offsets = [0, 0], sizes = [16, 8], strides = [1, 1]} : vector<16x32xf32> to vector<16x8xf32>
    %cst_23 = arith.constant dense<0.000000e+00> : vector<8x16xf32>
    %27 = tpu.matmul %25, %26, %cst_23 {dimension_numbers = #tpu.dot_dimension_numbers<[1], [1], [0], [0], [0, 0, 1, 0], [], []>} : vector<8x8xf32>, vector<16x8xf32>, vector<8x16xf32> -> vector<8x16xf32>
    %cst_24 = arith.constant dense<0xFF800000> : vector<8xf32>
    %28 = vector.multi_reduction <maximumf>, %27, %cst_24 [1] : vector<8x16xf32> to vector<8xf32>
    %29 = vector.shape_cast %28 : vector<8xf32> to vector<8x1xf32>
    %30 = vector.broadcast %29 : vector<8x1xf32> to vector<8x16xf32>
    %31 = arith.subf %27, %30 : vector<8x16xf32>
    %32 = math.exp %31 : vector<8x16xf32>
    %cst_25 = arith.constant dense<0.000000e+00> : vector<8xf32>
    %33 = vector.multi_reduction <add>, %32, %cst_25 [1] : vector<8x16xf32> to vector<8xf32>
    %34 = vector.shape_cast %33 : vector<8xf32> to vector<8x1xf32>
    %35 = vector.extract_strided_slice %24 {offsets = [0, 0], sizes = [16, 8], strides = [1, 1]} : vector<16x32xf32> to vector<16x8xf32>
    %cst_26 = arith.constant dense<0.000000e+00> : vector<8x8xf32>
    %36 = tpu.matmul %32, %35, %cst_26 {dimension_numbers = #tpu.dot_dimension_numbers<[1], [0], [0], [1], [0, 0, 1, 1], [], []>} : vector<8x16xf32>, vector<16x8xf32>, vector<8x8xf32> -> vector<8x8xf32>
    %cst_27 = arith.constant 1.000000e+00 : f32
    %37 = vector.broadcast %cst_27 : f32 to vector<8x1xf32>
    %38 = arith.divf %37, %34 : vector<8x1xf32>
    %39 = vector.broadcast %38 : vector<8x1xf32> to vector<8x8xf32>
    %40 = arith.mulf %36, %39 : vector<8x8xf32>
    %c0_28 = arith.constant 0 : index
    %c0_29 = arith.constant 0 : index
    %41 = vector.load %arg21[%c0_28, %c0_29] : memref<8x32xf32, #tpu.memory_space<vmem>>, vector<8x8xf32>
    tpu.vector_store %arg21[%c0_28, %c0_29], %40 {strides = array<i32>} : memref<8x32xf32, #tpu.memory_space<vmem>>, vector<8x8xf32>,
    %42 = vector.extract_strided_slice %22 {offsets = [0, 8], sizes = [8, 8], strides = [1, 1]} : vector<8x32xf32> to vector<8x8xf32>
    %43 = vector.extract_strided_slice %15 {offsets = [0, 8], sizes = [16, 8], strides = [1, 1]} : vector<16x32xf32> to vector<16x8xf32>
    %cst_30 = arith.constant dense<0.000000e+00> : vector<8x16xf32>
    %44 = tpu.matmul %42, %43, %cst_30 {dimension_numbers = #tpu.dot_dimension_numbers<[1], [1], [0], [0], [0, 0, 1, 0], [], []>} : vector<8x8xf32>, vector<16x8xf32>, vector<8x16xf32> -> vector<8x16xf32>
    %cst_31 = arith.constant dense<0xFF800000> : vector<8xf32>
    %45 = vector.multi_reduction <maximumf>, %44, %cst_31 [1] : vector<8x16xf32> to vector<8xf32>
    %46 = vector.shape_cast %45 : vector<8xf32> to vector<8x1xf32>
    %47 = vector.broadcast %46 : vector<8x1xf32> to vector<8x16xf32>
    %48 = arith.subf %44, %47 : vector<8x16xf32>
    %49 = math.exp %48 : vector<8x16xf32>
    %cst_32 = arith.constant dense<0.000000e+00> : vector<8xf32>
    %50 = vector.multi_reduction <add>, %49, %cst_32 [1] : vector<8x16xf32> to vector<8xf32>
    %51 = vector.shape_cast %50 : vector<8xf32> to vector<8x1xf32>
    %52 = vector.extract_strided_slice %24 {offsets = [0, 8], sizes = [16, 8], strides = [1, 1]} : vector<16x32xf32> to vector<16x8xf32>
    %cst_33 = arith.constant dense<0.000000e+00> : vector<8x8xf32>
    %53 = tpu.matmul %49, %52, %cst_33 {dimension_numbers = #tpu.dot_dimension_numbers<[1], [0], [0], [1], [0, 0, 1, 1], [], []>} : vector<8x16xf32>, vector<16x8xf32>, vector<8x8xf32> -> vector<8x8xf32>
    %cst_34 = arith.constant 1.000000e+00 : f32
    %54 = vector.broadcast %cst_34 : f32 to vector<8x1xf32>
    %55 = arith.divf %54, %51 : vector<8x1xf32>
    %56 = vector.broadcast %55 : vector<8x1xf32> to vector<8x8xf32>
    %57 = arith.mulf %53, %56 : vector<8x8xf32>
    %c0_35 = arith.constant 0 : index
    %c8 = arith.constant 8 : index
    %58 = vector.load %arg21[%c0_35, %c8] : memref<8x32xf32, #tpu.memory_space<vmem>>, vector<8x8xf32>
    tpu.vector_store %arg21[%c0_35, %c8], %57 {strides = array<i32>} : memref<8x32xf32, #tpu.memory_space<vmem>>, vector<8x8xf32>,
    %59 = vector.extract_strided_slice %22 {offsets = [0, 16], sizes = [8, 8], strides = [1, 1]} : vector<8x32xf32> to vector<8x8xf32>
    %60 = vector.extract_strided_slice %15 {offsets = [0, 16], sizes = [16, 8], strides = [1, 1]} : vector<16x32xf32> to vector<16x8xf32>
    %cst_36 = arith.constant dense<0.000000e+00> : vector<8x16xf32>
    %61 = tpu.matmul %59, %60, %cst_36 {dimension_numbers = #tpu.dot_dimension_numbers<[1], [1], [0], [0], [0, 0, 1, 0], [], []>} : vector<8x8xf32>, vector<16x8xf32>, vector<8x16xf32> -> vector<8x16xf32>
    %cst_37 = arith.constant dense<0xFF800000> : vector<8xf32>
    %62 = vector.multi_reduction <maximumf>, %61, %cst_37 [1] : vector<8x16xf32> to vector<8xf32>
    %63 = vector.shape_cast %62 : vector<8xf32> to vector<8x1xf32>
    %64 = vector.broadcast %63 : vector<8x1xf32> to vector<8x16xf32>
    %65 = arith.subf %61, %64 : vector<8x16xf32>
    %66 = math.exp %65 : vector<8x16xf32>
    %cst_38 = arith.constant dense<0.000000e+00> : vector<8xf32>
    %67 = vector.multi_reduction <add>, %66, %cst_38 [1] : vector<8x16xf32> to vector<8xf32>
    %68 = vector.shape_cast %67 : vector<8xf32> to vector<8x1xf32>
    %69 = vector.extract_strided_slice %24 {offsets = [0, 16], sizes = [16, 8], strides = [1, 1]} : vector<16x32xf32> to vector<16x8xf32>
    %cst_39 = arith.constant dense<0.000000e+00> : vector<8x8xf32>
    %70 = tpu.matmul %66, %69, %cst_39 {dimension_numbers = #tpu.dot_dimension_numbers<[1], [0], [0], [1], [0, 0, 1, 1], [], []>} : vector<8x16xf32>, vector<16x8xf32>, vector<8x8xf32> -> vector<8x8xf32>
    %cst_40 = arith.constant 1.000000e+00 : f32
    %71 = vector.broadcast %cst_40 : f32 to vector<8x1xf32>
    %72 = arith.divf %71, %68 : vector<8x1xf32>
    %73 = vector.broadcast %72 : vector<8x1xf32> to vector<8x8xf32>
    %74 = arith.mulf %70, %73 : vector<8x8xf32>
    %c0_41 = arith.constant 0 : index
    %c16 = arith.constant 16 : index
    %75 = vector.load %arg21[%c0_41, %c16] : memref<8x32xf32, #tpu.memory_space<vmem>>, vector<8x8xf32>
    tpu.vector_store %arg21[%c0_41, %c16], %74 {strides = array<i32>} : memref<8x32xf32, #tpu.memory_space<vmem>>, vector<8x8xf32>,
    %76 = vector.extract_strided_slice %22 {offsets = [0, 24], sizes = [8, 8], strides = [1, 1]} : vector<8x32xf32> to vector<8x8xf32>
    %77 = vector.extract_strided_slice %15 {offsets = [0, 24], sizes = [16, 8], strides = [1, 1]} : vector<16x32xf32> to vector<16x8xf32>
    %cst_42 = arith.constant dense<0.000000e+00> : vector<8x16xf32>
    %78 = tpu.matmul %76, %77, %cst_42 {dimension_numbers = #tpu.dot_dimension_numbers<[1], [1], [0], [0], [0, 0, 1, 0], [], []>} : vector<8x8xf32>, vector<16x8xf32>, vector<8x16xf32> -> vector<8x16xf32>
    %cst_43 = arith.constant dense<0xFF800000> : vector<8xf32>
    %79 = vector.multi_reduction <maximumf>, %78, %cst_43 [1] : vector<8x16xf32> to vector<8xf32>
    %80 = vector.shape_cast %79 : vector<8xf32> to vector<8x1xf32>
    %81 = vector.broadcast %80 : vector<8x1xf32> to vector<8x16xf32>
    %82 = arith.subf %78, %81 : vector<8x16xf32>
    %83 = math.exp %82 : vector<8x16xf32>
    %cst_44 = arith.constant dense<0.000000e+00> : vector<8xf32>
    %84 = vector.multi_reduction <add>, %83, %cst_44 [1] : vector<8x16xf32> to vector<8xf32>
    %85 = vector.shape_cast %84 : vector<8xf32> to vector<8x1xf32>
    %86 = vector.extract_strided_slice %24 {offsets = [0, 24], sizes = [16, 8], strides = [1, 1]} : vector<16x32xf32> to vector<16x8xf32>
    %cst_45 = arith.constant dense<0.000000e+00> : vector<8x8xf32>
    %87 = tpu.matmul %83, %86, %cst_45 {dimension_numbers = #tpu.dot_dimension_numbers<[1], [0], [0], [1], [0, 0, 1, 1], [], []>} : vector<8x16xf32>, vector<16x8xf32>, vector<8x8xf32> -> vector<8x8xf32>
    %cst_46 = arith.constant 1.000000e+00 : f32
    %88 = vector.broadcast %cst_46 : f32 to vector<8x1xf32>
    %89 = arith.divf %88, %85 : vector<8x1xf32>
    %90 = vector.broadcast %89 : vector<8x1xf32> to vector<8x8xf32>
    %91 = arith.mulf %87, %90 : vector<8x8xf32>
    %c0_47 = arith.constant 0 : index
    %c24 = arith.constant 24 : index
    %92 = vector.load %arg21[%c0_47, %c24] : memref<8x32xf32, #tpu.memory_space<vmem>>, vector<8x8xf32>
    tpu.vector_store %arg21[%c0_47, %c24], %91 {strides = array<i32>} : memref<8x32xf32, #tpu.memory_space<vmem>>, vector<8x8xf32>,
    %c0_48 = arith.constant 0 : index
    %c0_49 = arith.constant 0 : index
    %93 = vector.load %arg21[%c0_48, %c0_49] : memref<8x32xf32, #tpu.memory_space<vmem>>, vector<8x32xf32>
    %c0_50 = arith.constant 0 : index
    %c0_51 = arith.constant 0 : index
    %94 = vector.load %arg11[%c0_50, %c0_51] : memref<32x32xf32, #tpu.memory_space<vmem>>, vector<32x32xf32>
    %cst_52 = arith.constant dense<0.000000e+00> : vector<8x32xf32>
    %95 = tpu.matmul %93, %94, %cst_52 {dimension_numbers = #tpu.dot_dimension_numbers<[1], [0], [0], [1], [0, 0, 1, 1], [], []>} : vector<8x32xf32>, vector<32x32xf32>, vector<8x32xf32> -> vector<8x32xf32>
    %c0_53 = arith.constant 0 : index
    %c0_54 = arith.constant 0 : index
    %96 = vector.load %arg12[%c0_53, %c0_54] : memref<1x32xf32, #tpu.memory_space<vmem>>, vector<1x32xf32>
    %97 = vector.broadcast %96 : vector<1x32xf32> to vector<8x32xf32>
    %98 = arith.addf %95, %97 : vector<8x32xf32>
    %c0_55 = arith.constant 0 : index
    %c0_56 = arith.constant 0 : index
    %99 = vector.load %arg13[%c0_55, %c0_56] : memref<32x64xf32, #tpu.memory_space<vmem>>, vector<32x64xf32>
    %cst_57 = arith.constant dense<0.000000e+00> : vector<8x64xf32>
    %100 = tpu.matmul %1, %99, %cst_57 {dimension_numbers = #tpu.dot_dimension_numbers<[1], [0], [0], [1], [0, 0, 1, 1], [], []>} : vector<8x32xf32>, vector<32x64xf32>, vector<8x64xf32> -> vector<8x64xf32>
    %c0_58 = arith.constant 0 : index
    %c0_59 = arith.constant 0 : index
    %101 = vector.load %arg14[%c0_58, %c0_59] : memref<32x64xf32, #tpu.memory_space<vmem>>, vector<32x64xf32>
    %cst_60 = arith.constant dense<0.000000e+00> : vector<8x64xf32>
    %102 = tpu.matmul %98, %101, %cst_60 {dimension_numbers = #tpu.dot_dimension_numbers<[1], [0], [0], [1], [0, 0, 1, 1], [], []>} : vector<8x32xf32>, vector<32x64xf32>, vector<8x64xf32> -> vector<8x64xf32>
    %103 = arith.addf %100, %102 : vector<8x64xf32>
    %c0_61 = arith.constant 0 : index
    %c0_62 = arith.constant 0 : index
    %104 = vector.load %arg15[%c0_61, %c0_62] : memref<1x64xf32, #tpu.memory_space<vmem>>, vector<1x64xf32>
    %105 = vector.broadcast %104 : vector<1x64xf32> to vector<8x64xf32>
    %106 = arith.addf %103, %105 : vector<8x64xf32>
    %c0_63 = arith.constant 0 : index
    %c0_64 = arith.constant 0 : index
    %107 = vector.load %arg16[%c0_63, %c0_64] : memref<1x64xf32, #tpu.memory_space<vmem>>, vector<1x64xf32>
    %108 = vector.broadcast %107 : vector<1x64xf32> to vector<8x64xf32>
    %109 = arith.mulf %106, %108 : vector<8x64xf32>
    %c0_65 = arith.constant 0 : index
    %c0_66 = arith.constant 0 : index
    %110 = vector.load %arg17[%c0_65, %c0_66] : memref<1x64xf32, #tpu.memory_space<vmem>>, vector<1x64xf32>
    %111 = vector.broadcast %110 : vector<1x64xf32> to vector<8x64xf32>
    %112 = arith.addf %109, %111 : vector<8x64xf32>
    %cst_67 = arith.constant 0.000000e+00 : f32
    %113 = vector.broadcast %cst_67 : f32 to vector<8x64xf32>
    %114 = arith.maximumf %112, %113 : vector<8x64xf32>
    %c0_68 = arith.constant 0 : index
    %c0_69 = arith.constant 0 : index
    %115 = vector.load %arg18[%c0_68, %c0_69] : memref<64x32xf32, #tpu.memory_space<vmem>>, vector<64x32xf32>
    %cst_70 = arith.constant dense<0.000000e+00> : vector<8x32xf32>
    %116 = tpu.matmul %114, %115, %cst_70 {dimension_numbers = #tpu.dot_dimension_numbers<[1], [0], [0], [1], [0, 0, 1, 1], [], []>} : vector<8x64xf32>, vector<64x32xf32>, vector<8x32xf32> -> vector<8x32xf32>
    %c0_71 = arith.constant 0 : index
    %c0_72 = arith.constant 0 : index
    %117 = vector.load %arg19[%c0_71, %c0_72] : memref<1x32xf32, #tpu.memory_space<vmem>>, vector<1x32xf32>
    %118 = vector.broadcast %117 : vector<1x32xf32> to vector<8x32xf32>
    %119 = arith.addf %116, %118 : vector<8x32xf32>
    %120 = arith.addf %1, %119 : vector<8x32xf32>
    %c0_73 = arith.constant 0 : index
    %c0_74 = arith.constant 0 : index
    %c0_75 = arith.constant 0 : index
    %121 = vector.load %arg20[%c0_73, %c0_74, %c0_75] : memref<1x8x32xf32, #tpu.memory_space<vmem>>, vector<1x8x32xf32>
    %122 = vector.shape_cast %121 : vector<1x8x32xf32> to vector<8x32xf32>
    %123 = vector.shape_cast %120 : vector<8x32xf32> to vector<1x8x32xf32>
    tpu.vector_store %arg20[%c0_73, %c0_74, %c0_75], %123 {strides = array<i32>} : memref<1x8x32xf32, #tpu.memory_space<vmem>>, vector<1x8x32xf32>,
    return
  }
  func.func @transform_0(%arg0: i32, %arg1: i32) -> (i32, i32, i32) {
    %c0_i32 = arith.constant 0 : i32
    %c0_i32_0 = arith.constant 0 : i32
    return %arg0, %arg1, %c0_i32 : i32, i32, i32
  }
  func.func @transform_1(%arg0: i32, %arg1: i32) -> (i32, i32, i32) {
    %c0_i32 = arith.constant 0 : i32
    %c0_i32_0 = arith.constant 0 : i32
    %c0_i32_1 = arith.constant 0 : i32
    return %arg0, %c0_i32, %c0_i32_0 : i32, i32, i32
  }
  func.func @transform_2(%arg0: i32, %arg1: i32) -> (i32, i32, i32) {
    %c0_i32 = arith.constant 0 : i32
    %c0_i32_0 = arith.constant 0 : i32
    %c0_i32_1 = arith.constant 0 : i32
    return %arg0, %c0_i32, %c0_i32_0 : i32, i32, i32
  }
  func.func @transform_3(%arg0: i32, %arg1: i32) -> (i32, i32) {
    %c0_i32 = arith.constant 0 : i32
    %c0_i32_0 = arith.constant 0 : i32
    %c0_i32_1 = arith.constant 0 : i32
    return %c0_i32, %c0_i32_0 : i32, i32
  }
  func.func @transform_4(%arg0: i32, %arg1: i32) -> (i32, i32) {
    %c0_i32 = arith.constant 0 : i32
    %c0_i32_0 = arith.constant 0 : i32
    %c0_i32_1 = arith.constant 0 : i32
    return %c0_i32, %c0_i32_0 : i32, i32
  }
  func.func @transform_5(%arg0: i32, %arg1: i32) -> (i32, i32) {
    %c0_i32 = arith.constant 0 : i32
    %c0_i32_0 = arith.constant 0 : i32
    %c0_i32_1 = arith.constant 0 : i32
    return %c0_i32, %c0_i32_0 : i32, i32
  }
  func.func @transform_6(%arg0: i32, %arg1: i32) -> (i32, i32) {
    %c0_i32 = arith.constant 0 : i32
    %c0_i32_0 = arith.constant 0 : i32
    %c0_i32_1 = arith.constant 0 : i32
    return %c0_i32, %c0_i32_0 : i32, i32
  }
  func.func @transform_7(%arg0: i32, %arg1: i32) -> (i32, i32) {
    %c0_i32 = arith.constant 0 : i32
    %c0_i32_0 = arith.constant 0 : i32
    %c0_i32_1 = arith.constant 0 : i32
    return %c0_i32, %c0_i32_0 : i32, i32
  }
  func.func @transform_8(%arg0: i32, %arg1: i32) -> (i32, i32) {
    %c0_i32 = arith.constant 0 : i32
    %c0_i32_0 = arith.constant 0 : i32
    %c0_i32_1 = arith.constant 0 : i32
    return %c0_i32, %c0_i32_0 : i32, i32
  }
  func.func @transform_9(%arg0: i32, %arg1: i32) -> (i32, i32) {
    %c0_i32 = arith.constant 0 : i32
    %c0_i32_0 = arith.constant 0 : i32
    %c0_i32_1 = arith.constant 0 : i32
    return %c0_i32, %c0_i32_0 : i32, i32
  }
  func.func @transform_10(%arg0: i32, %arg1: i32) -> (i32, i32) {
    %c0_i32 = arith.constant 0 : i32
    %c0_i32_0 = arith.constant 0 : i32
    %c0_i32_1 = arith.constant 0 : i32
    return %c0_i32, %c0_i32_0 : i32, i32
  }
  func.func @transform_11(%arg0: i32, %arg1: i32) -> (i32, i32) {
    %c0_i32 = arith.constant 0 : i32
    %c0_i32_0 = arith.constant 0 : i32
    %c0_i32_1 = arith.constant 0 : i32
    return %c0_i32, %c0_i32_0 : i32, i32
  }
  func.func @transform_12(%arg0: i32, %arg1: i32) -> (i32, i32) {
    %c0_i32 = arith.constant 0 : i32
    %c0_i32_0 = arith.constant 0 : i32
    %c0_i32_1 = arith.constant 0 : i32
    return %c0_i32, %c0_i32_0 : i32, i32
  }
  func.func @transform_13(%arg0: i32, %arg1: i32) -> (i32, i32) {
    %c0_i32 = arith.constant 0 : i32
    %c0_i32_0 = arith.constant 0 : i32
    %c0_i32_1 = arith.constant 0 : i32
    return %c0_i32, %c0_i32_0 : i32, i32
  }
  func.func @transform_14(%arg0: i32, %arg1: i32) -> (i32, i32) {
    %c0_i32 = arith.constant 0 : i32
    %c0_i32_0 = arith.constant 0 : i32
    %c0_i32_1 = arith.constant 0 : i32
    return %c0_i32, %c0_i32_0 : i32, i32
  }
  func.func @transform_15(%arg0: i32, %arg1: i32) -> (i32, i32) {
    %c0_i32 = arith.constant 0 : i32
    %c0_i32_0 = arith.constant 0 : i32
    %c0_i32_1 = arith.constant 0 : i32
    return %c0_i32, %c0_i32_0 : i32, i32
  }
  func.func @transform_16(%arg0: i32, %arg1: i32) -> (i32, i32) {
    %c0_i32 = arith.constant 0 : i32
    %c0_i32_0 = arith.constant 0 : i32
    %c0_i32_1 = arith.constant 0 : i32
    return %c0_i32, %c0_i32_0 : i32, i32
  }
  func.func @transform_17(%arg0: i32, %arg1: i32) -> (i32, i32) {
    %c0_i32 = arith.constant 0 : i32
    %c0_i32_0 = arith.constant 0 : i32
    %c0_i32_1 = arith.constant 0 : i32
    return %c0_i32, %c0_i32_0 : i32, i32
  }
  func.func @transform_18(%arg0: i32, %arg1: i32) -> (i32, i32, i32) {
    %c0_i32 = arith.constant 0 : i32
    %c0_i32_0 = arith.constant 0 : i32
    return %arg0, %arg1, %c0_i32 : i32, i32, i32
  }
}

</mosaic_0001>

<bundles_post_ra>
// kernel: tpu_custom_call.1
= control target key start
LH: loop header
LB: loop body
LE: loop exit
PB: predicated region body
PF: predicated region fallthrough
CT: control target
= control target key end

     0   :  { %s3714_s0 = inlined_call_operand.hbm [shape: f32[2,8,32], index: 0, kind: input, shape index: {}]   ;;  %s3715_s1 = inlined_call_operand.vmem [shape: f32[2,16,32], index: 1, kind: input, shape index: {}]   ;;  %s3716_s2 = inlined_call_operand.vmem [shape: f32[2,16,1], index: 2, kind: input, shape index: {}]   ;;  %s3717_s3 = inlined_call_operand.vmem [shape: f32[32,32], index: 3, kind: input, shape index: {}]   ;;  %s3718_s4 = inlined_call_operand.hbm [shape: f32[1,32], index: 4, kind: input, shape index: {}]   ;;  %s3719_s5 = inlined_call_operand.vmem [shape: f32[32,32], index: 5, kind: input, shape index: {}]   ;;  %s3720_s6 = inlined_call_operand.hbm [shape: f32[1,32], index: 6, kind: input, shape index: {}]   ;;  %s3721_s7 = inlined_call_operand.vmem [shape: f32[32,32], index: 7, kind: input, shape index: {}]   ;;  %s3722_s8 = inlined_call_operand.hbm [shape: f32[1,32], index: 8, kind: input, shape index: {}]   ;;  %s3723_s9 = inlined_call_operand.hbm [shape: f32[32,32], index: 9, kind: input, shape index: {}]   ;;  %s3724_s10 = inlined_call_operand.vmem [shape: f32[1,32], index: 10, kind: input, shape index: {}]   ;;  %s3725_s11 = inlined_call_operand.hbm [shape: f32[32,64], index: 11, kind: input, shape index: {}]   ;;  %s3726_s12 = inlined_call_operand.hbm [shape: f32[32,64], index: 12, kind: input, shape index: {}]   ;;  %s3727_s13 = inlined_call_operand.vmem [shape: f32[1,64], index: 13, kind: input, shape index: {}]   ;;  %s3728_s14 = inlined_call_operand.vmem [shape: f32[1,64], index: 14, kind: input, shape index: {}]   ;;  %s3729_s15 = inlined_call_operand.vmem [shape: f32[1,64], index: 15, kind: input, shape index: {}]   ;;  %s3730_s16 = inlined_call_operand.vmem [shape: f32[64,32], index: 16, kind: input, shape index: {}]   ;;  %s3731_s17 = inlined_call_operand.vmem [shape: f32[1,32], index: 17, kind: input, shape index: {}]   ;;  %s3732_s18 = inlined_call_operand.hbm [shape: f32[2,8,32], index: 18, kind: output, shape index: {}]  }
   0x1   :  { %3744 = sst [smem:[#allocation21_spill]] %s3714_s0 }
   0x2   :  { %3745 = sst [smem:[#allocation22_spill]] %s3715_s1 }
   0x3   :  { %3746 = sst [smem:[#allocation23_spill]] %s3716_s2 }
   0x4   :  { %3747 = sst [smem:[#allocation24_spill]] %s3717_s3 }
   0x5   :  { %3748 = sst [smem:[#allocation25_spill]] %s3718_s4 }
   0x6   :  { %3749 = sst [smem:[#allocation26_spill]] %s3720_s6 }
   0x7   :  { %3750 = sst [smem:[#allocation27_spill]] %s3721_s7 }
   0x8   :  { %3751 = sst [smem:[#allocation28_spill]] %s3722_s8 }
   0x9   :  { %3752 = sst [smem:[#allocation29_spill]] %s3723_s9 }
   0xa   :  { %3753 = sst [smem:[#allocation30_spill]] %s3724_s10 }
   0xb   :  { %3754 = sst [smem:[#allocation31_spill]] %s3727_s13 }
   0xc   :  { %3755 = sst [smem:[#allocation32_spill]] %s3728_s14 }
   0xd   :  { %3756 = sst [smem:[#allocation33_spill]] %s3729_s15 }
   0xe   :  { %3757 = sst [smem:[#allocation34_spill]] %s3730_s16 }
   0xf   :  { %3758 = sst [smem:[#allocation35_spill]] %s3731_s17 }
  0x10   :  { %3759 = sst [smem:[#allocation36_spill]] %s3732_s18 }
  0x11   :  { %23 = vsyncpa [#allocation4], 0 }
  0x12   :  { %25 = vsyncpa [#allocation4 + $0x1], 0 }
  0x13   :  { %26 = vsyncpa [#allocation7], 0 }
  0x14   :  { %27 = vsyncpa [#allocation10], 0 }
  0x15   :  { %28 = vsyncpa [#allocation13], 0 }
  0x16   :  { %29 = vsyncpa [#allocation5], 0 }
  0x17   :  { %31 = vsyncpa [#allocation5 + $0x1], 0  ;;  %s3186_s27 = smov 0   ;;  %s3188_s28 = smov 0  }
  0x18   :  { %s3190_s29 = smov 0   ;;  %s3192_s30 = smov 0  }
  0x19   :  { %s3194_s0 = smov 0   ;;  %s3196_s19 = smov 0  }
  0x1a LB: > { %s3734_s1 = sadd.s32 4294967295, %s3069_s19   ;;  %p2246_p0 = scmp.ge.s32.totalorder %s3069_s19, 1  ;;  %s3069_s19 = sphi %s3196_s19, %s37_s19   ;;  %s3065_s0 = sphi %s3194_s0, %s3799_s0   ;;  %s3061_s30 = sphi %s3192_s30, %s3798_s30   ;;  %s3057_s29 = sphi %s3190_s29, %s3797_s29   ;;  %s3053_s28 = sphi %s3188_s28, %s3796_s28   ;;  %s3049_s27 = sphi %s3186_s27, %s3795_s27  }
  0x1b   : > { %p3220_p1 = scmp.eq.s32.totalorder %s3734_s1, 0  ;;  %p477_p2 = scmp.lt.s32.totalorder %s3069_s19, 3 }
  0x1c   : > { %s3071_s22 = smov [#allocation6]   ;;  %s3072_s23 = smov [#allocation9]  }
  0x1d   : > { %s3760_s20 = scalar_select %p3220_p1, 1, 0 }
  0x1e   : > { %p3225_p3 = pnand %p2246_p0, %p477_p2  ;;  %s493_s2 = sshll.u32 %s3071_s22, 4  ;;  %s494_s2 = int_to_ptr.vmem [resolvable:$true] %s493_s2 }
  0x1f   : > { %s521_s24 = sshll.u32 %s3072_s23, 4  ;;  %s3073_s26 = smov [#allocation12]   ;;  %s3238_s24 = int_to_ptr.vmem [resolvable:$true] %s521_s24 }
  0x20   : > { %s3761_s21 = scalar_select %p3225_p3, 1, 0 }
  0x21   : > { %p2622_p5 = pneg %p3225_p3  ;;  %s3240_s1 = sshll.u32 %s3073_s26, 4  ;;  %s548_s1 = int_to_ptr.vmem [resolvable:$true] %s3240_s1 }
  0x22   : > { %s3763_s4 = sld [smem:[#allocation25_spill]] }
  0x23   : > { %p3234_p6 = pnand %p2622_p5, %p3220_p1 }
  0x25   : > { %p3250_p8 = pneg %p3234_p6 }
  0x28   : > { %s2777_s22 = scalar_lea.hbm %s3763_s4, 16 }
  0x29   : > { %p2778_p7 = scmp.ne.s32.totalorder %s3763_s4, %s2777_s22  ;;  %p2784_p11 = scmp.lt.u32.totalorder %s2777_s22, %s3763_s4 }
  0x2b   : > { %p2780_p9 = pnand %p3250_p8, %p2778_p7 }
  0x2d   : > { %p2781_p10 = pneg %p2780_p9 }
  0x2f   : > { %p2786_p12 = pnand %p2784_p11, %p2781_p10 }
  0x31   : > { %2789 = shalt.err (!%p2786_p12)
}
  0x32   : > { %s2790_s17 = scalar_lea.vmem %s494_s2, 16  ;;  %s2797_s14 = scalar_lea.vmem %s494_s2, 32 }
  0x33   : > { %p2791_p13 = scmp.ne.s32.totalorder %s494_s2, %s2790_s17  ;;  %p2798_p5 = scmp.lt.s32.totalorder %s494_s2, %s494_s2 }
  0x34   : > { %p2799_p4 = scmp.lt.s32.totalorder %s2797_s14, %s2790_s17 }
  0x35   : > { %p2793_p0 = pnand %p2791_p13, %p3250_p8 }
  0x36   : > { %p2800_p3 = por %p2799_p4, %p2798_p5 }
  0x37   : > { %p2794_p2 = pneg %p2793_p0 }
  0x39   : > { %p2801_p1 = pnand %p2800_p3, %p2794_p2 }
  0x3b   : > { %2804 = shalt.err (!%p2801_p1)
}
  0x3c   : > { %2625 = dma.hbm_to_vmem [thread:$0]  (!%p3234_p6), %s3763_s4, 16, %s494_s2, [#allocation7]  }
  0x3d   : > { %s3765_s8 = sld [smem:[#allocation28_spill]] }
  0x43   : > { %s2805_s26 = scalar_lea.hbm %s3765_s8, 16 }
  0x44   : > { %p2806_p7 = scmp.ne.s32.totalorder %s3765_s8, %s2805_s26  ;;  %p2812_p1 = scmp.lt.u32.totalorder %s2805_s26, %s3765_s8 }
  0x46   : > { %p2808_p9 = pnand %p2806_p7, %p3250_p8 }
  0x48   : > { %p2809_p4 = pneg %p2808_p9 }
  0x4a   : > { %p2814_p3 = pnand %p2812_p1, %p2809_p4 }
  0x4c   : > { %2817 = shalt.err (!%p2814_p3)
}
  0x4d   : > { %s2818_s2 = scalar_lea.vmem %s3238_s24, 16  ;;  %s2825_s10 = scalar_lea.vmem %s3238_s24, 32 }
  0x4e   : > { %p2819_p10 = scmp.ne.s32.totalorder %s3238_s24, %s2818_s2  ;;  %p2826_p13 = scmp.lt.s32.totalorder %s3238_s24, %s3238_s24 }
  0x4f   : > { %p2827_p0 = scmp.lt.s32.totalorder %s2825_s10, %s2818_s2 }
  0x50   : > { %p2821_p11 = pnand %p2819_p10, %p3250_p8 }
  0x51   : > { %p2828_p2 = por %p2827_p0, %p2826_p13 }
  0x52   : > { %p2822_p12 = pneg %p2821_p11 }
  0x54   : > { %p2829_p5 = pnand %p2828_p2, %p2822_p12 }
  0x56   : > { %2832 = shalt.err (!%p2829_p5)
}
  0x57   : > { %2631 = dma.hbm_to_vmem [thread:$0]  (!%p3234_p6), %s3765_s8, 16, %s3238_s24, [#allocation10]  }
  0x58   : > { %s2833_s22 = scalar_lea.hbm %s3725_s11, 512 }
  0x59   : > { %p2834_p7 = scmp.ne.s32.totalorder %s3725_s11, %s2833_s22  ;;  %p2840_p1 = scmp.lt.u32.totalorder %s2833_s22, %s3725_s11 }
  0x5b   : > { %p2836_p9 = pnand %p2834_p7, %p3250_p8 }
  0x5d   : > { %p2837_p4 = pneg %p2836_p9 }
  0x5f   : > { %p2842_p3 = pnand %p2840_p1, %p2837_p4 }
  0x61   : > { %2845 = shalt.err (!%p2842_p3)
}
  0x62   : > { %s2846_s10 = scalar_lea.vmem %s548_s1, 512  ;;  %p2854_p13 = scmp.lt.s32.totalorder %s548_s1, %s548_s1 }
  0x63   : > { %p2847_p10 = scmp.ne.s32.totalorder %s548_s1, %s2846_s10  ;;  %p2855_p0 = scmp.lt.s32.totalorder %s2846_s10, %s2846_s10 }
  0x65   : > { %p2849_p11 = pnand %p2847_p10, %p3250_p8  ;;  %p2856_p2 = por %p2855_p0, %p2854_p13 }
  0x67   : > { %p2850_p12 = pneg %p2849_p11 }
  0x69   : > { %p2857_p5 = pnand %p2856_p2, %p2850_p12 }
  0x6b   : > { %2860 = shalt.err (!%p2857_p5)
}
  0x6c   : > { %s3074_s24 = smov 128   ;;  %s3075_s16 = smov 8  }
  0x6d   : > { %2637 = dma.hbm_to_vmem [thread:$0]  (!%p3234_p6), %s3725_s11, 512, %s548_s1, [#allocation13], %s3074_s24, %s3074_s24, %s3075_s16  }
  0x6e   : > { %s3076_s13 = smov [#allocation8]   ;;  %s3077_s26 = smov [#allocation11]  }
  0x6f   : > { %s507_s22 = sshll.u32 %s3076_s13, 4  ;;  %s531_s17 = sshll.u32 %s3077_s26, 4  ;;  %s508_s22 = int_to_ptr.vmem [resolvable:$true] %s507_s22  ;;  %s532_s17 = int_to_ptr.vmem [resolvable:$true] %s531_s17 }
  0x70   : > { %s3766_s6 = sld [smem:[#allocation26_spill]] }
  0x76   : > { %s2861_s10 = scalar_lea.hbm %s3766_s6, 16 }
  0x77   : > { %p2862_p7 = scmp.ne.s32.totalorder %s3766_s6, %s2861_s10  ;;  %p2868_p1 = scmp.lt.u32.totalorder %s2861_s10, %s3766_s6 }
  0x79   : > { %p2864_p9 = pnand %p2862_p7, %p3250_p8 }
  0x7b   : > { %p2865_p4 = pneg %p2864_p9 }
  0x7d   : > { %p2870_p3 = pnand %p2868_p1, %p2865_p4 }
  0x7f   : > { %2873 = shalt.err (!%p2870_p3)
}
  0x80   : > { %s2874_s1 = scalar_lea.vmem %s508_s22, 16  ;;  %s2881_s15 = scalar_lea.vmem %s508_s22, 32 }
  0x81   : > { %p2875_p10 = scmp.ne.s32.totalorder %s508_s22, %s2874_s1  ;;  %p2882_p13 = scmp.lt.s32.totalorder %s508_s22, %s508_s22 }
  0x82   : > { %p2883_p0 = scmp.lt.s32.totalorder %s2881_s15, %s2874_s1 }
  0x83   : > { %p2877_p11 = pnand %p2875_p10, %p3250_p8 }
  0x84   : > { %p2884_p2 = por %p2883_p0, %p2882_p13 }
  0x85   : > { %p2878_p12 = pneg %p2877_p11 }
  0x87   : > { %p2885_p5 = pnand %p2884_p2, %p2878_p12 }
  0x89   : > { %2888 = shalt.err (!%p2885_p5)
}
  0x8a   : > { %2628 = dma.hbm_to_vmem [thread:$0]  (!%p3234_p6), %s3766_s6, 16, %s508_s22, [#allocation7]  }
  0x8b   : > { %s3767_s9 = sld [smem:[#allocation29_spill]] }
  0x91   : > { %s2889_s18 = scalar_lea.hbm %s3767_s9, 512 }
  0x92   : > { %p2890_p7 = scmp.ne.s32.totalorder %s3767_s9, %s2889_s18  ;;  %p2896_p1 = scmp.lt.u32.totalorder %s2889_s18, %s3767_s9 }
  0x94   : > { %p2892_p9 = pnand %p2890_p7, %p3250_p8 }
  0x96   : > { %p2893_p4 = pneg %p2892_p9 }
  0x98   : > { %p2898_p3 = pnand %p2896_p1, %p2893_p4 }
  0x9a   : > { %2901 = shalt.err (!%p2898_p3)
}
  0x9b   : > { %s2902_s10 = scalar_lea.vmem %s532_s17, 512  ;;  %p2910_p13 = scmp.lt.s32.totalorder %s532_s17, %s532_s17 }
  0x9c   : > { %p2903_p10 = scmp.ne.s32.totalorder %s532_s17, %s2902_s10  ;;  %p2911_p0 = scmp.lt.s32.totalorder %s2902_s10, %s2902_s10 }
  0x9e   : > { %p2905_p11 = pnand %p2903_p10, %p3250_p8  ;;  %p2912_p2 = por %p2911_p0, %p2910_p13 }
  0xa0   : > { %p2906_p12 = pneg %p2905_p11 }
  0xa2   : > { %p2913_p5 = pnand %p2912_p2, %p2906_p12 }
  0xa4   : > { %2916 = shalt.err (!%p2913_p5)
}
  0xa5   : > { %2634 = dma.hbm_to_vmem [thread:$0]  (!%p3234_p6), %s3767_s9, 512, %s532_s17, [#allocation10], %s3074_s24, %s3074_s24, %s3075_s16  }
  0xa6   : > { %s3078_s15 = smov [#allocation14]   ;;  %s2917_s7 = scalar_lea.hbm %s3726_s12, 512 }
  0xa7   : > { %s560_s4 = sshll.u32 %s3078_s15, 4  ;;  %p2918_p7 = scmp.ne.s32.totalorder %s3726_s12, %s2917_s7  ;;  %s561_s4 = int_to_ptr.vmem [resolvable:$true] %s560_s4 }
  0xa8   : > { %p2924_p1 = scmp.lt.u32.totalorder %s2917_s7, %s3726_s12 }
  0xa9   : > { %p2920_p9 = pnand %p2918_p7, %p3250_p8 }
  0xab   : > { %p2921_p4 = pneg %p2920_p9 }
  0xad   : > { %p2926_p3 = pnand %p2924_p1, %p2921_p4 }
  0xaf   : > { %2929 = shalt.err (!%p2926_p3)
}
  0xb0   : > { %s2930_s17 = scalar_lea.vmem %s561_s4, 512  ;;  %p2938_p13 = scmp.lt.s32.totalorder %s561_s4, %s561_s4 }
  0xb1   : > { %p2931_p10 = scmp.ne.s32.totalorder %s561_s4, %s2930_s17  ;;  %p2939_p0 = scmp.lt.s32.totalorder %s2930_s17, %s2930_s17 }
  0xb3   : > { %p2933_p11 = pnand %p2931_p10, %p3250_p8  ;;  %p2940_p2 = por %p2939_p0, %p2938_p13 }
  0xb5   : > { %p2934_p12 = pneg %p2933_p11 }
  0xb7   : > { %p2941_p5 = pnand %p2940_p2, %p2934_p12 }
  0xb9   : > { %2944 = shalt.err (!%p2941_p5)
}
  0xba   : > { %2640 = dma.hbm_to_vmem [thread:$0]  (!%p3234_p6), %s3726_s12, 512, %s561_s4, [#allocation13], %s3074_s24, %s3074_s24, %s3075_s16  }
  0xbb   : > { %s2245_s25 = sadd.s32 4294967294, %s3069_s19   ;;  %s49_s23 = sadd.s32 1, %s3065_s0 }
  0xbc   : > { %p51_p8 = scmp.ge.s32.totalorder %s49_s23, 2  ;;  %s58_s22 = sadd.s32 1, %s3057_s29 }
  0xbd   : > { %p65_p7 = scmp.ne.s32.totalorder %s3057_s29, %s3053_s28  ;;  %p66_p9 = scmp.eq.s32.totalorder %s3069_s19, 0 }
  0xbe   : > { %s3801_s23 = smov (%p51_p8, %s49_s23), 0  ;;  %p71_p1 = scmp.ne.s32.totalorder %s3053_s28, %s3049_s27 }
  0xbf   : > { %p3380_p4 = por %p66_p9, %p65_p7  ;;  %s53_s24 = ssub.s32 %s3065_s0, %s3801_s23 }
  0xc0   : > { %s3769_s16 = sadd.s32 4294967295, %s3069_s19   ;;  %p56_p3 = scmp.eq.s32.totalorder %s53_s24, 0 }
  0xc1   : > { %p464_p6 = scmp.eq.s32.totalorder %s3769_s16, 1  ;;  %p3770_p10 = scmp.ne.s32.totalorder %s3760_s20, 0 }
  0xc2   : > { %p470_p13 = scmp.eq.s32.totalorder %s2245_s25, 1  ;;  %p2655_p2 = scmp.lt.s32.totalorder %s3069_s19, 2 }
  0xc3   : > { %p3392_p11 = por %p3770_p10, %p71_p1  ;;  %p3396_p12 = por %p464_p6, %p65_p7 }
  0xc4   : > { %s3401_s8 = scalar_select %p56_p3, %s3057_s29, %s58_s22  }
  0xc5   : > { %s3772_s4 = scalar_select %p3396_p12, 1, 0 }
  0xc6   : > { %p3403_p0 = por %p470_p13, %p71_p1  ;;  %s589_s7 = sand.u32 1, %s3057_s29  }
  0xc7   : > { %s2255_s18 = sshll.u32 %s3065_s0, 7  ;;  %s2254_s13 = sshll.u32 %s589_s7, 3 }
  0xc8   : > { %s3773_s3 = scalar_select %p3403_p0, 1, 0 }
  0xc9   : > { %s3774_s17 = sld [smem:[#allocation21_spill]]  ;;  %s593_s10 = scalar_lea.vmem [#allocation3], %s2254_s13 }
  0xca   : > { %s601_s25 = sshll.u32 %s593_s10, 4  ;;  %p3417_p5 = pnand %p2655_p2, %p3380_p4  ;;  %s3421_s25 = int_to_ptr.vmem [resolvable:$true] %s601_s25 }
  0xcb   : > { %s590_s24 = scalar_lea.sflag [#allocation4], %s589_s7 }
  0xcc   : > { %p2947_p7 = pneg %p3417_p5 }
  0xcf   : > { %s3413_s2 = scalar_lea.hbm %s3774_s17, %s2255_s18  ;;  %s2950_s1 = scalar_lea.hbm %s3774_s17, 256 }
  0xd0   : > { %s2945_s16 = scalar_lea.hbm %s3413_s2, 128  ;;  %p2951_p4 = scmp.lt.u32.totalorder %s3413_s2, %s3774_s17 }
  0xd1   : > { %p2946_p8 = scmp.ne.s32.totalorder %s3413_s2, %s2945_s16  ;;  %p2952_p6 = scmp.lt.u32.totalorder %s2950_s1, %s2945_s16 }
  0xd2   : > { %p2954_p10 = scmp.lt.u32.totalorder %s2945_s16, %s3413_s2 }
  0xd3   : > { %p2948_p9 = pnand %p2947_p7, %p2946_p8  ;;  %p2953_p3 = por %p2952_p6, %p2951_p4 }
  0xd5   : > { %p2949_p1 = pneg %p2948_p9  ;;  %p2955_p13 = por %p2954_p10, %p2953_p3 }
  0xd7   : > { %p2956_p2 = pnand %p2955_p13, %p2949_p1 }
  0xd9   : > { %2959 = shalt.err (!%p2956_p2)
}
  0xda   : > { %s2960_s7 = scalar_lea.vmem %s3421_s25, 128  ;;  %s3079_s10 = smov [#allocation3]  }
  0xdb   : > { %p2961_p8 = scmp.ne.s32.totalorder %s3421_s25, %s2960_s7  ;;  %s2965_s18 = sshll.u32 %s3079_s10, 4  ;;  %s2966_s18 = int_to_ptr.vmem [resolvable:$false] %s2965_s18 }
  0xdc   : > { %s2967_s13 = scalar_lea.vmem %s2966_s18, 256  ;;  %p2968_p12 = scmp.lt.s32.totalorder %s3421_s25, %s2966_s18 }
  0xdd   : > { %p2963_p9 = pnand %p2961_p8, %p2947_p7  ;;  %p2969_p4 = scmp.lt.s32.totalorder %s2967_s13, %s2960_s7 }
  0xdf   : > { %p2964_p0 = pneg %p2963_p9  ;;  %p2970_p6 = por %p2969_p4, %p2968_p12 }
  0xe1   : > { %p2971_p3 = pnand %p2970_p6, %p2964_p0 }
  0xe3   : > { %2974 = shalt.err (!%p2971_p3)
}
  0xe4   : > { %2644 = dma.hbm_to_vmem [thread:$0]  (!%p3417_p5), %s3413_s2, 128, %s3421_s25, %s590_s24  }
  0xe5   : > { %p3776_p1 = scmp.ne.s32.totalorder %s3761_s21, 0 }
  0xe6   : > { %s3451_s16 = sand.u32 (!%p3776_p1), 1, %s3053_s28  }
  0xe7   : > { %626 = sbr.rel (%p3776_p1) target bundleno = 2357 (0x935), region = 92  ;;  %s3743_s1 = sshll.u32 (!%p3776_p1), %s3451_s16, 3 }
  0xe8   : > { %s629_s26 = scalar_lea.sflag (!%p3776_p1), [#allocation4], %s3451_s16  ;;  %s3457_s14 = scalar_lea.vmem (!%p3776_p1), [#allocation3], %s3743_s1 }
  0xee   : > { %3028 = dma.done.wait (%p3392_p11), %s629_s26, 128  }
  0xef   : > { %3030 = vsyncadd (%p3392_p11), %s629_s26, 4294967168  ;;  %p3777_p12 = scmp.ne.s32.totalorder %s3760_s20, 0 }
  0xf1   : > { %3032 = dma.done.wait (%p3777_p12), [#allocation7], 32  }
  0xf2   : > { %3034 = vsyncadd (%p3777_p12), [#allocation7], 4294967264 }
  0xf3   : > { %3036 = dma.done.wait (%p3777_p12), [#allocation10], 528  }
  0xf4   : > { %3038 = vsyncadd (%p3777_p12), [#allocation10], 4294966768 }
  0xf5   : > { %3040 = dma.done.wait (%p3777_p12), [#allocation13], 1024  }
  0xf6   : > { %3042 = vsyncadd (%p3777_p12), [#allocation13], 4294966272  ;;  %p719_p11 = scmp.lt.s32.totalorder %s3061_s30, 1  ;;  %v3080_v0 = vmov 0.0|0.0   ;;  %vm3081_vm0 = vmmov 0   ;;  %v3082_v1 = vmov 0.0  }
  0xf7   : > { %2514 = vmatprep.subr.bf16.mxu0 %v3080_v0  ;;  %2381 = vmatprep.mubr.msk.f32.mxu0 %vm3081_vm0, %v3082_v1  ;;  %v3083_v2 = vmov 0   ;;  %s3778_s20 = sld [smem:[#allocation22_spill]]  ;;  %vm745_vm1 = vcmask 261120   ;;  %v819_v3 = vld [vmem:[%s3719_s5] sm:$0xff]  ;;  %v820_v4 = vld [vmem:[%s3719_s5 + $0x8] sm:$0xff]  ;;  %v821_v5 = vld [vmem:[%s3719_s5 + $0x10] sm:$0xff] }
  0xf8   : > { %s720_s21 = scalar_select %p719_p11, %s3061_s30, 1  ;;  %2734 = vset.pattern.permute.xlu1 %v3083_v2  ;;  %2760 = vset.pattern.permute.xlu0 %v3083_v2  ;;  %v2520_v6 = vpack.c.bf16 %v820_v4, %v819_v3  ;;  %v822_v7 = vld [vmem:[%s3719_s5 + $0x18] sm:$0xff]  ;;  %v3513_v19 = vld [vmem:[%s3457_s14] sm:$0xff]  ;;  %vm1010_vm2 = vcmask 64512   ;;  %vm1090_vm4 = vcmask 130048   ;;  %vm1356_vm5 = vcmask 130112  }
  0xf9   : > { %v2524_v9 = vpack.c.bf16 %v822_v7, %v821_v5  ;;  %s3780_s7 = sld [smem:[#allocation24_spill]]  ;;  %v2271_v26 = vld [vmem:[#allocation8] ss:$0 sm:$0xff]  ;;  %v2269_v30 = vld [vmem:[#allocation6] ss:$0 sm:$0xff]  ;;  %vm3540_vm3 = vmpackc.low %vm1010_vm2, %vm1010_vm2  ;;  %s3084_s10 = smov 112  }
  0xfa   : > { %s2306_s15 = sshll.u32 %s720_s21, 4  ;;  %s3779_s21 = sld [smem:[#allocation23_spill]]  ;;  %2521 = vmatprep.subr.bf16.mxu1 %v2520_v6  ;;  %v2274_v50 = vld [vmem:[#allocation9] ss:$0 sm:$0xff]  ;;  %vm1535_vm6 = vcmask 195712   ;;  %vm1714_vm7 = vcmask 261312  }
  0xfb   : > { %2523 = vmatpush3.bf16.msra.mxu1 %v2520_v6  ;;  %s3085_s18 = smov 120   ;;  %s3086_s13 = smov 104   ;;  %vm1992_vm8 = vcmask 523264  }
  0xfc   : > { %2525 = vmatprep.subr.bf16.mxu1 %v2524_v9  ;;  %s3087_s6 = smov 8   ;;  %s3088_s1 = smov 16  }
  0xfd   : > { %s723_s22 = scalar_lea.vmem %s3778_s20, %s2306_s15  ;;  %s3785_s24 = sld [smem:[#allocation30_spill]] }
  0xfe   : > { %v730_v8 = vld [vmem:[%s723_s22] sm:$0xff]  ;;  %v731_v18 = vld [vmem:[%s723_s22 + $0x8] sm:$0xff]  ;;  %s3784_s22 = sld [smem:[#allocation34_spill]]  ;;  %s3788_s26 = sld [smem:[#allocation33_spill]] }
  0xff   : > { %2392 = vmatprep.mubr.msk.f32.mxu1 %vm745_vm1, %v730_v8  ;;  %v734_v10 = vld [vmem:[%s3780_s7] sm:$0xff]  ;;  %v735_v11 = vld [vmem:[%s3780_s7 + $0x8] sm:$0xff]  ;;  %v736_v12 = vld [vmem:[%s3780_s7 + $0x10] sm:$0xff]  ;;  %2527 = vmatpush3.bf16.msra.mxu1 %v2524_v9  ;;  %s3789_s25 = sld [smem:[#allocation35_spill]]  ;;  %s2303_s20 = sshll.u32 %s3061_s30, 7 }
 0x100   : > { %s728_s9 = scalar_lea.vmem %s3779_s21, %s2306_s15  ;;  %v2515_v13 = vpack.c.bf16 %v735_v11, %v734_v10  ;;  %v737_v14 = vld [vmem:[%s3780_s7 + $0x18] sm:$0xff]  ;;  %2536 = vmatprep.subr.bf16.mxu1 %v3080_v0  ;;  %s3781_s21 = sld [smem:[#allocation27_spill]] }
 0x101   : > { %v732_v15 = vld [vmem:[%s728_s9] sm:$0xff]  ;;  %v2518_v16 = vpack.c.bf16 %v737_v14, %v736_v12  ;;  %v733_v17 = vld [vmem:[%s728_s9 + $0x8] sm:$0xff]  ;;  %s3089_s15 = smov 24   ;;  %s2069_s30 = scalar_lea.sflag [#allocation5], %s3451_s16 }
 0x102   : > { %1000 = vperm.xlu1 %2734, %v732_v15   ;;  %2516 = vmatpush3.bf16.msra.mxu0 %v2515_v13  ;;  %p3792_p5 = scmp.ne.s32.totalorder %s3772_s4, 0 }
 0x103   : > { %2517 = vmatprep.subr.bf16.mxu0 %v3080_v0  ;;  %2393 = vmatmul.mubr.msk.f32.vlgmr.msra.gmra.mrb[0].mxu1 %vm745_vm1, %v731_v18 }
 0x104   : > { %2410 = vmatprep.mubr.msk.f32.mxu1 %vm3081_vm0, %v3082_v1 }
 0x106   : > { %1005 = vperm.xlu1 %2734, %v733_v17   ;;  %2519 = vmatpush3.bf16.msra.mxu0 %v2518_v16  ;;  %v911_v20 = vld [vmem:[%s3781_s21] sm:$0xff]  ;;  %v912_v21 = vld [vmem:[%s3781_s21 + $0x8] sm:$0xff]  ;;  %v913_v22 = vld [vmem:[%s3781_s21 + $0x10] sm:$0xff] }
 0x107   : > { %v2528_v23 = vpack.c.bf16 %v912_v21, %v911_v20  ;;  %v914_v24 = vld [vmem:[%s3781_s21 + $0x18] sm:$0xff] }
 0x108   : > { %v2532_v25 = vpack.c.bf16 %v914_v24, %v913_v22 }
 0x109   : > { %2382 = vmatmul.mubr.msk.f32.vlgmr.msra.gmra.mrb[0].mxu0 %vm745_vm1, %v3513_v19  ;;  %2529 = vmatprep.subr.bf16.mxu0 %v2528_v23 }
 0x10a   : > { %2403 = vmatprep.mubr.msk.f32.mxu0 %vm745_vm1, %v730_v8  ;;  %2531 = vmatpush3.bf16.msra.mxu0 %v2528_v23 }
 0x10b   : > { %2533 = vmatprep.subr.bf16.mxu0 %v2532_v25 }
 0x10e   : > { %2535 = vmatpush3.bf16.msra.mxu0 %v2532_v25 }
 0x10f   : > { %2540 = vmatprep.subr.bf16.mxu0 %v3080_v0 }
 0x111   : > { %2404 = vmatmul.mubr.msk.f32.vlgmr.msra.gmra.mrb[2].mxu0 %vm745_vm1, %v731_v18 }
 0x112   : > { %2417 = vmatprep.mubr.msk.f32.mxu0 %vm3081_vm0, %v3082_v1 }
 0x181   : > { %v1001_v49 = vpop.permute.xlu1 %1000 }
 0x185   : > { %v1006_v53 = vpop.permute.xlu1 %1005 }
 0x1d6   : > { %v2394_v27 = vpop.f32.mrb[0].mxu1 }
 0x1d7   : > { %v908_v28 = vadd.f32 %v2394_v27, %v2271_v26  ;;  %v902_v29 = vpop.f32.mrb[1].mxu1 }
 0x1d8   : > { %v903_v32 = vadd.f32 %v2271_v26, %v902_v29 }
 0x1da   : > { %v2537_v34 = vpack.c.bf16 %v908_v28, %v903_v32  ;;  %v2740_v35 = vpack.i.bf16 %v908_v28, %v903_v32 }
 0x1dc   : > { %v815_v31 = vpop.f32.mrb[0].mxu0  ;;  %2741 = vrot.lane.b32.xlu1 %v2740_v35, %s3084_s10  ;;  %2730 = vrot.lane.b32.xlu0 %v2740_v35, %s3085_s18 }
 0x1dd   : > { %v2383_v33 = vpop.f32.mrb[1].mxu0  ;;  %v816_v37 = vadd.f32 %v2269_v30, %v815_v31  ;;  %2539 = vmatpush3.bf16.xpose.msk.msra.mxu1 %vm3540_vm3, %v2537_v34 }
 0x1de   : > { %2543 = vmatprep.subr.bf16.mxu1 %v3080_v0 }
 0x1df   : > { %v997_v38 = vmul.f32 0.35355338, %v816_v37 }
 0x1e1   : > { %1177 = vrot.lane.b32.xlu0 %v997_v38, %s3085_s18 }
 0x1e4   : > { %2411 = vmatmul.mubr.msk.f32.vlgmr.msra.gmra.mrb[2].mxu1 %vm1010_vm2, %v997_v38  ;;  %v2405_v39 = vpop.f32.mrb[2].mxu0 }
 0x1e5   : > { %2424 = vmatprep.mubr.msk.f32.mxu1 %vm3081_vm0, %v3082_v1  ;;  %v988_v40 = vpop.f32.mrb[3].mxu0  ;;  %v994_v51 = vadd.f32 %v2405_v39, %v2274_v50 }
 0x1e6   : > { %v989_v52 = vadd.f32 %v2274_v50, %v988_v40 }
 0x1e7   : > { %v1009_v54 = vmul.f32 %v1006_v53, %v994_v51 }
 0x1e8   : > { %v1008_v55 = vmul.f32 %v1001_v49, %v989_v52 }
 0x1ea   : > { %v2541_v56 = vpack.c.bf16 %v1009_v54, %v1008_v55  ;;  %v2735_v57 = vpack.i.bf16 %v1009_v54, %v1008_v55 }
 0x1ec   : > { %2542 = vmatpush3.bf16.msra.mxu0 %v2541_v56 }
 0x1ed   : > { %2547 = vmatprep.subr.bf16.mxu0 %v3080_v0 }
 0x24e   : > { %v2731_v41 = vpop.permute.xlu0 %2730  ;;  %v2742_v12 = vpop.permute.xlu1 %2741 }
 0x24f   : > { %v2733_v42 = vunpack.i.h.bf16 %v2731_v41  ;;  %v2732_v43 = vunpack.i.l.bf16 %v2731_v41  ;;  %v2744_v16 = vunpack.i.h.bf16 %v2742_v12  ;;  %v2743_v17 = vunpack.i.l.bf16 %v2742_v12 }
 0x251   : > { %v2544_v44 = vpack.c.bf16 %v2733_v42, %v2732_v43  ;;  %v2551_v20 = vpack.c.bf16 %v2744_v16, %v2743_v17 }
 0x253   : > { %2546 = vmatpush3.bf16.xpose.msk.msra.mxu1 %vm3540_vm3, %v2544_v44  ;;  %v1178_v45 = vpop.permute.xlu0 %1177 }
 0x254   : > { %2557 = vmatprep.subr.bf16.mxu1 %v3080_v0 }
 0x25a   : > { %2425 = vmatmul.mubr.msk.f32.vlgmr.msra.gmra.mrb[4].mxu1 %vm1010_vm2, %v1178_v45 }
 0x25b   : > { %2452 = vmatprep.mubr.msk.f32.mxu1 %vm3081_vm0, %v3082_v1 }
 0x2b7   : > { %v1086_v46 = vpop.f32.mrb[2].mxu1 }
 0x2b8   : > { %v1091_v47 = vsel %vm1090_vm4, %v1086_v46, -inf  ;;  %v2412_v48 = vpop.f32.mrb[3].mxu1 }
 0x2b9   : > { %1092 = vmax.xlane.f32.xlu0 %v1091_v47 }
 0x2cf   : > { %2736 = vrot.lane.b32.xlu0 %v2735_v57, %s3085_s18  ;;  %s3786_s18 = sld [smem:[#allocation31_spill]] }
 0x2d3   : > { %2746 = vrot.lane.b32.xlu0 %v2740_v35, %s3086_s13 }
 0x2d7   : > { %1537 = vrot.lane.b32.xlu0 %v997_v38, %s3086_s13 }
 0x32d   : > { %v1255_v58 = vpop.f32.mrb[4].mxu1 }
 0x32e   : > { %v2426_v59 = vpop.f32.mrb[5].mxu1  ;;  %v1259_v60 = vsel %vm1090_vm4, %v1255_v58, -inf }
 0x32f   : > { %1260 = vmax.xlane.f32.xlu1 %v1259_v60 }
 0x340   : > { %1358 = vrot.lane.b32.xlu1 %v997_v38, %s3084_s10 }
 0x346   : > { %v1093_v61 = vpop.xlane.xlu0 %1092 }
 0x347   : > { %v1094_v62 = vsub.f32 %v1086_v46, %v1093_v61  ;;  %v1717_v61 = vld [vmem:[#allocation11] sm:$0xff] }
 0x349   : > { %v1095_v63 = vmul.f32 1.442695, %v1094_v62  ;;  %v1718_v62 = vld [vmem:[#allocation11 + $0x8] sm:$0xff] }
 0x34a   : > { %v2737_v2 = vpop.permute.xlu0 %2736 }
 0x34b   : > { %2761 = vpow2.f32 %v1095_v63  ;;  %v2739_v4 = vunpack.i.h.bf16 %v2737_v2  ;;  %v2738_v5 = vunpack.i.l.bf16 %v2737_v2  ;;  %v2565_v63 = vpack.c.bf16 %v1718_v62, %v1717_v61  ;;  %v1719_v2 = vld [vmem:[#allocation11 + $0x10] sm:$0xff] }
 0x34d   : > { %v2548_v9 = vpack.c.bf16 %v2739_v4, %v2738_v5 }
 0x34e   : > { %v2747_v3 = vpop.permute.xlu0 %2746 }
 0x34f   : > { %v2749_v6 = vunpack.i.h.bf16 %v2747_v3  ;;  %v2748_v7 = vunpack.i.l.bf16 %v2747_v3  ;;  %v1720_v3 = vld [vmem:[#allocation11 + $0x18] sm:$0xff] }
 0x350   : > { %v2568_v4 = vpack.c.bf16 %v1720_v3, %v1719_v2 }
 0x351   : > { %v2558_v8 = vpack.c.bf16 %v2749_v6, %v2748_v7 }
 0x352   : > { %v1538_v11 = vpop.permute.xlu0 %1537 }
 0x353   : > { %2560 = vmatpush3.bf16.xpose.msk.msra.mxu1 %vm3540_vm3, %v2558_v8 }
 0x354   : > { %2570 = vmatprep.subr.bf16.mxu1 %v3080_v0 }
 0x355   : > { %v2762_v10 = vpop.eup %2761 }
 0x356   : > { %2418 = vmatmul.mubr.msk.f32.vlgmr.msra.gmra.mrb[4].mxu0 %vm1090_vm4, %v2762_v10  ;;  %v1097_v39 = vsel %vm1090_vm4, %v2762_v10, 0.0  ;;  %v1806_v10 = vld [vmem:[#allocation14 + $0x8] sm:$0xff] }
 0x357   : > { %2549 = vmatpush3.bf16.msra.mxu0 %v2548_v9  ;;  %2431 = vmatprep.mubr.msk.f32.mxu0 %vm3081_vm0, %v3082_v1  ;;  %v1805_v9 = vld [vmem:[#allocation14] sm:$0xff] }
 0x358   : > { %2550 = vmatprep.subr.bf16.mxu0 %v3080_v0 }
 0x35a   : > { %2453 = vmatmul.mubr.msk.f32.vlgmr.msra.gmra.mrb[6].mxu1 %vm1010_vm2, %v1538_v11 }
 0x35b   : > { %2481 = vmatprep.mubr.msk.f32.mxu1 %vm3081_vm0, %v3082_v1 }
 0x3bc   : > { %v1261_v13 = vpop.xlane.xlu1 %1260 }
 0x3bd   : > { %v1262_v14 = vsub.f32 %v1255_v58, %v1261_v13  ;;  %v2571_v13 = vpack.c.bf16 %v1806_v10, %v1805_v9 }
 0x3bf   : > { %v1263_v15 = vmul.f32 1.442695, %v1262_v14  ;;  %2572 = vmatpush3.bf16.msra.mxu1 %v2571_v13 }
 0x3c0   : > { %v1359_v21 = vpop.permute.xlu1 %1358  ;;  %2573 = vmatprep.subr.bf16.mxu1 %v3080_v0 }
 0x3c1   : > { %2763 = vpow2.f32 %v1263_v15 }
 0x3cb   : > { %v2764_v18 = vpop.eup %2763 }
 0x3cc   : > { %2432 = vmatmul.mubr.msk.f32.vlgmr.msra.gmra.mrb[6].mxu0 %vm1090_vm4, %v2764_v18  ;;  %v1265_v38 = vsel %vm1090_vm4, %v2764_v18, 0.0  ;;  %v1801_v18 = vld [vmem:[#allocation12] sm:$0xff] }
 0x3cd   : > { %2553 = vmatpush3.bf16.xpose.msk.msra.mxu0 %vm3540_vm3, %v2551_v20  ;;  %2438 = vmatprep.mubr.msk.f32.mxu0 %vm3081_vm0, %v3082_v1  ;;  %v1802_v20 = vld [vmem:[#allocation12 + $0x8] sm:$0xff] }
 0x3ce   : > { %2554 = vmatprep.subr.bf16.mxu0 %v3080_v0 }
 0x3d4   : > { %2439 = vmatmul.mubr.msk.f32.vlgmr.msra.gmra.mrb[8].mxu0 %vm1010_vm2, %v1359_v21  ;;  %v2577_v21 = vpack.c.bf16 %v1802_v20, %v1801_v18 }
 0x3d5   : > { %2445 = vmatprep.mubr.msk.f32.mxu0 %vm3081_vm0, %v3082_v1 }
 0x429   : > { %v1169_v22 = vpop.f32.mrb[4].mxu0 }
 0x42a   : > { %v2419_v23 = vpop.f32.mrb[5].mxu0 }
 0x42b   : > { %v1804_v23 = vld [vmem:[#allocation12 + $0x18] sm:$0xff] }
 0x42d   : > { %v1615_v24 = vpop.f32.mrb[6].mxu1 }
 0x42e   : > { %v2454_v25 = vpop.f32.mrb[7].mxu1  ;;  %v1619_v26 = vsel %vm1090_vm4, %v1615_v24, -inf }
 0x42f   : > { %1620 = vmax.xlane.f32.xlu0 %v1619_v26  ;;  %v1807_v26 = vld [vmem:[#allocation14 + $0x10] sm:$0xff] }
 0x445   : > { %2751 = vrot.lane.b32.xlu0 %v2735_v57, %s3084_s10 }
 0x49f   : > { %v1345_v27 = vpop.f32.mrb[6].mxu0 }
 0x4a0   : > { %v2433_v28 = vpop.f32.mrb[7].mxu0 }
 0x4a7   : > { %v1436_v29 = vpop.f32.mrb[8].mxu0 }
 0x4a8   : > { %v2440_v30 = vpop.f32.mrb[9].mxu0  ;;  %v1440_v31 = vsel %vm1090_vm4, %v1436_v29, -inf }
 0x4a9   : > { %1441 = vmax.xlane.f32.xlu1 %v1440_v31  ;;  %v1978_v30 = vld [vmem:[%s3784_s22 + $0x8] sm:$0xff]  ;;  %v2293_v31 = vld [vmem:[%s3785_s24] ss:$0 sm:$0xff]  ;;  %s3790_s24 = sshll.u32 %s3451_s16, 3 }
 0x4aa   : > { %s718_s10 = scalar_lea.vmem [#allocation15], %s3790_s24 }
 0x4ba   : > { %2756 = vrot.lane.b32.xlu1 %v2735_v57, %s3086_s13 }
 0x4bc   : > { %v1621_v32 = vpop.xlane.xlu0 %1620 }
 0x4bd   : > { %v1622_v33 = vsub.f32 %v1615_v24, %v1621_v32 }
 0x4bf   : > { %v1623_v42 = vmul.f32 1.442695, %v1622_v33 }
 0x4c0   : > { %v2752_v34 = vpop.permute.xlu0 %2751 }
 0x4c1   : > { %v2754_v35 = vunpack.i.h.bf16 %v2752_v34  ;;  %v2753_v36 = vunpack.i.l.bf16 %v2752_v34 }
 0x4c3   : > { %v2555_v37 = vpack.c.bf16 %v2754_v35, %v2753_v36 }
 0x4c5   : > { %2556 = vmatpush3.bf16.msra.mxu0 %v2555_v37 }
 0x4c6   : > { %2561 = vmatprep.subr.bf16.mxu0 %v3080_v0 }
 0x4de   : > { %1266 = vadd.xlane.f32.xlu1 %v1265_v38  ;;  %v1979_v38 = vld [vmem:[%s3784_s22 + $0x10] sm:$0xff] }
 0x4e2   : > { %1098 = vadd.xlane.f32.xlu1 %v1097_v39  ;;  %v1980_v39 = vld [vmem:[%s3784_s22 + $0x18] sm:$0xff] }
 0x536   : > { %v1442_v40 = vpop.xlane.xlu1 %1441 }
 0x537   : > { %v1443_v41 = vsub.f32 %v1436_v29, %v1442_v40  ;;  %v1977_v29 = vld [vmem:[%s3784_s22] sm:$0xff]  ;;  %v2586_v40 = vpack.c.bf16 %v1980_v39, %v1979_v38 }
 0x538   : > { %v2583_v33 = vpack.c.bf16 %v1978_v30, %v1977_v29 }
 0x539   : > { %v1444_v43 = vmul.f32 1.442695, %v1443_v41  ;;  %v1982_v41 = vld [vmem:[%s3784_s22 + $0x28] sm:$0xff] }
 0x53a   : > { %v2757_v44 = vpop.permute.xlu1 %2756 }
 0x53b   : > { %2765 = vpow2.f32 %v1444_v43  ;;  %v2759_v45 = vunpack.i.h.bf16 %v2757_v44  ;;  %v2758_v46 = vunpack.i.l.bf16 %v2757_v44  ;;  %v1983_v43 = vld [vmem:[%s3784_s22 + $0x30] sm:$0xff]  ;;  %v1984_v44 = vld [vmem:[%s3784_s22 + $0x38] sm:$0xff] }
 0x53c   : > { %2767 = vpow2.f32 %v1623_v42 }
 0x53d   : > { %v2562_v48 = vpack.c.bf16 %v2759_v45, %v2758_v46  ;;  %v2592_v45 = vpack.c.bf16 %v1984_v44, %v1983_v43 }
 0x545   : > { %v2766_v47 = vpop.eup %2765 }
 0x546   : > { %2446 = vmatmul.mubr.msk.f32.vlgmr.msra.gmra.mrb[10].mxu0 %vm1090_vm4, %v2766_v47  ;;  %v1446_v49 = vsel %vm1090_vm4, %v2766_v47, 0.0  ;;  %v2768_v50 = vpop.eup %2767  ;;  %v2297_v47 = vld [vmem:[%s3786_s18] ss:$0 sm:$0xff]  ;;  %s2083_s18 = sshll.u32 %s718_s10, 4  ;;  %s3666_s18 = int_to_ptr.vmem [resolvable:$true] %s2083_s18 }
 0x547   : > { %2563 = vmatpush3.bf16.msra.mxu0 %v2562_v48  ;;  %1447 = vadd.xlane.f32.xlu0 %v1446_v49  ;;  %v1625_v51 = vsel %vm1090_vm4, %v2768_v50, 0.0  ;;  %s2975_s9 = scalar_lea.vmem %s3666_s18, 128 }
 0x548   : > { %2459 = vmatprep.mubr.msk.f32.mxu0 %vm3081_vm0, %v3082_v1  ;;  %2564 = vmatprep.subr.bf16.mxu0 %v3080_v0  ;;  %p2976_p0 = scmp.ne.s32.totalorder %s3666_s18, %s2975_s9 }
 0x54a   : > { %2460 = vmatmul.mubr.msk.f32.vlgmr.msra.gmra.mrb[12].mxu0 %vm1090_vm4, %v2768_v50  ;;  %p2977_p7 = pnand %p2976_p0, %p3792_p5 }
 0x54b   : > { %1626 = vadd.xlane.f32.xlu0 %v1625_v51  ;;  %2470 = vmatprep.mubr.msk.f32.mxu0 %vm3081_vm0, %v3082_v1  ;;  %v2299_v51 = vld [vmem:[%s3788_s26] ss:$0 sm:$0xff]  ;;  %s3090_s26 = smov [#allocation15]  }
 0x54c   : > { %2566 = vmatpush3.bf16.msra.mxu0 %v2565_v63  ;;  %p2978_p10 = pneg %p2977_p7  ;;  %s2979_s2 = sshll.u32 %s3090_s26, 4  ;;  %s2980_s2 = int_to_ptr.vmem [resolvable:$false] %s2979_s2 }
 0x54d   : > { %2567 = vmatprep.subr.bf16.mxu0 %v3080_v0  ;;  %s2981_s14 = scalar_lea.vmem %s2980_s2, 256  ;;  %p2982_p13 = scmp.lt.s32.totalorder %s3666_s18, %s2980_s2 }
 0x54e   : > { %p2983_p2 = scmp.lt.s32.totalorder %s2981_s14, %s2975_s9 }
 0x550   : > { %2569 = vmatpush3.bf16.msra.mxu0 %v2568_v4  ;;  %p2984_p8 = por %p2983_p2, %p2982_p13 }
 0x551   : > { %2576 = vmatprep.subr.bf16.mxu0 %v3080_v0 }
 0x552   : > { %p2985_p9 = pnand %p2984_p8, %p2978_p10 }
 0x56b   : > { %v1267_v52 = vpop.xlane.xlu1 %1266 }
 0x56c   : > { %2769 = vrcp.f32 %v1267_v52 }
 0x56f   : > { %v1099_v53 = vpop.xlane.xlu1 %1098 }
 0x570   : > { %2771 = vrcp.f32 %v1099_v53 }
 0x576   : > { %v2770_v54 = vpop.eup %2769 }
 0x577   : > { %v1351_v55 = vmul.f32 %v2770_v54, %v1345_v27  ;;  %v1808_v27 = vld [vmem:[#allocation14 + $0x18] sm:$0xff] }
 0x578   : > { %v2574_v28 = vpack.c.bf16 %v1808_v27, %v1807_v26 }
 0x579   : > { %1353 = vrot.lane.b32.xlu0 %v1351_v55, %s3087_s6  ;;  %v2300_v55 = vld [vmem:[%s3789_s25] ss:$0 sm:$0xff] }
 0x57a   : > { %v2772_v56 = vpop.eup %2771  ;;  %2575 = vmatpush3.bf16.msra.mxu1 %v2574_v28 }
 0x57b   : > { %v1175_v57 = vmul.f32 %v2772_v56, %v1169_v22  ;;  %v1803_v22 = vld [vmem:[#allocation12 + $0x10] sm:$0xff]  ;;  %2582 = vmatprep.subr.bf16.mxu1 %v3080_v0 }
 0x57c   : > { %v2580_v25 = vpack.c.bf16 %v1804_v23, %v1803_v22 }
 0x57d   : > { %1176 = vst.msk [vmem:[#allocation2] sm:$0xff] %vm1010_vm2, %v1175_v57 }
 0x5d4   : > { %v1448_v58 = vpop.xlane.xlu0 %1447 }
 0x5d5   : > { %2773 = vrcp.f32 %v1448_v58 }
 0x5d8   : > { %v1627_v59 = vpop.xlane.xlu0 %1626 }
 0x5d9   : > { %2775 = vrcp.f32 %v1627_v59 }
 0x5df   : > { %v2774_v5 = vpop.eup %2773 }
 0x5e3   : > { %v2776_v11 = vpop.eup %2775 }
 0x5eb   : > { %v1354_v60 = vpop.permute.xlu0 %1353 }
 0x5ec   : > { %1357 = vst.msk [vmem:[#allocation2] sm:$0xff] %vm1356_vm5, %v1354_v60 }
 0x619   : > { %v1524_v6 = vpop.f32.mrb[10].mxu0 }
 0x61a   : > { %v1530_v7 = vmul.f32 %v2774_v5, %v1524_v6  ;;  %v2447_v8 = vpop.f32.mrb[11].mxu0 }
 0x61c   : > { %1532 = vrot.lane.b32.xlu1 %v1530_v7, %s3088_s1  ;;  %s3787_s1 = sld [smem:[#allocation32_spill]] }
 0x61d   : > { %v1703_v12 = vpop.f32.mrb[12].mxu0 }
 0x61e   : > { %v1709_v14 = vmul.f32 %v2776_v11, %v1703_v12  ;;  %v2461_v15 = vpop.f32.mrb[13].mxu0 }
 0x620   : > { %1711 = vrot.lane.b32.xlu1 %v1709_v14, %s3089_s15 }
 0x68e   : > { %v1533_v16 = vpop.permute.xlu1 %1532 }
 0x68f   : > { %1536 = vst.msk [vmem:[#allocation2] sm:$0xff] %vm1535_vm6, %v1533_v16 }
 0x692   : > { %v1712_v17 = vpop.permute.xlu1 %1711 }
 0x693   : > { %1715 = vst.msk [vmem:[#allocation2] sm:$0xff] %vm1714_vm7, %v1712_v17 }
 0x69a   : > { %v1716_v24 = vld [vmem:[#allocation2] sm:$0xff] }
 0x69b   : > { %2471 = vmatmul.mubr.msk.f32.vlgmr.msra.gmra.mrb[14].mxu0 %vm745_vm1, %v1716_v24 }
 0x69c   : > { %2578 = vmatpush3.bf16.msra.mxu0 %v2577_v21  ;;  %2492 = vmatprep.mubr.msk.f32.mxu0 %vm3081_vm0, %v3082_v1 }
 0x69d   : > { %2579 = vmatprep.subr.bf16.mxu0 %v3080_v0 }
 0x6a0   : > { %2581 = vmatpush3.bf16.msra.mxu0 %v2580_v25 }
 0x6a3   : > { %2493 = vmatmul.mubr.msk.f32.vlgmr.msra.gmra.mrb[16].mxu0 %vm745_vm1, %v3513_v19 }
 0x76e   : > { %v1797_v32 = vpop.f32.mrb[14].mxu0 }
 0x76f   : > { %v1798_v34 = vadd.f32 %v2293_v31, %v1797_v32  ;;  %v2472_v35 = vpop.f32.mrb[15].mxu0 }
 0x771   : > { %2482 = vmatmul.mubr.msk.f32.vlgmr.msra.gmra.mrb[8].mxu1 %vm745_vm1, %v1798_v34 }
 0x772   : > { %2584 = vmatpush3.bf16.msra.mxu1 %v2583_v33  ;;  %2511 = vmatprep.mubr.msk.f32.mxu1 %vm3081_vm0, %v3082_v1  ;;  %v1981_v1 = vld [vmem:[%s3784_s22 + $0x20] sm:$0xff] }
 0x773   : > { %2585 = vmatprep.subr.bf16.mxu1 %v3080_v0  ;;  %v2589_v42 = vpack.c.bf16 %v1982_v41, %v1981_v1 }
 0x776   : > { %v1948_v36 = vpop.f32.mrb[16].mxu0  ;;  %2587 = vmatpush3.bf16.msra.mxu1 %v2586_v40 }
 0x777   : > { %v2494_v37 = vpop.f32.mrb[17].mxu0  ;;  %2588 = vmatprep.subr.bf16.mxu1 %v3080_v0 }
 0x77a   : > { %2590 = vmatpush3.bf16.msra.mxu1 %v2589_v42 }
 0x77b   : > { %2591 = vmatprep.subr.bf16.mxu1 %v3080_v0  ;;  %v2298_v0 = vld [vmem:[%s3787_s1] ss:$0 sm:$0xff]  ;;  %s3791_s1 = sld [smem:[#allocation36_spill]] }
 0x77e   : > { %2593 = vmatpush3.bf16.msra.mxu1 %v2592_v45 }
 0x781   : > { %s3664_s15 = scalar_lea.hbm %s3791_s1, %s2303_s20 }
 0x844   : > { %v1878_v46 = vpop.f32.mrb[8].mxu1 }
 0x845   : > { %v1949_v48 = vadd.f32 %v1948_v36, %v1878_v46  ;;  %v2483_v49 = vpop.f32.mrb[9].mxu1 }
 0x847   : > { %v1959_v50 = vadd.f32 %v2297_v47, %v1949_v48 }
 0x849   : > { %v1967_v52 = vmul.f32 %v2298_v0, %v1959_v50 }
 0x84b   : > { %v1975_v53 = vadd.f32 %v2299_v51, %v1967_v52 }
 0x84d   : > { %v1976_v54 = vmax.f32 %v1975_v53, 0.0 }
 0x84f   : > { %2512 = vmatmul.mubr.msk.f32.vlgmr.msra.gmra.mrb[10].mxu1 %vm1992_vm8, %v1976_v54 }
 0x922   : > { %v2062_v56 = vpop.f32.mrb[10].mxu1 }
 0x923   : > { %v2063_v57 = vadd.f32 %v2300_v55, %v2062_v56  ;;  %v2513_v58 = vpop.f32.mrb[11].mxu1 }
 0x925   : > { %v2066_v59 = vadd.f32 %v2063_v57, %v3513_v19 }
 0x927   : > { %2067 = vst.msk [vmem:[%s718_s10] sm:$0xff] %vm745_vm1, %v2066_v59 }
 0x928   : > { %2988 = shalt.err (!%p2985_p9)
}
 0x929   : > { %s2989_s16 = scalar_lea.hbm %s3664_s15, 128  ;;  %s2993_s24 = scalar_lea.hbm %s3791_s1, 256 }
 0x92a   : > { %p2990_p4 = scmp.ne.s32.totalorder %s3664_s15, %s2989_s16  ;;  %p2994_p1 = scmp.lt.u32.totalorder %s3664_s15, %s3791_s1 }
 0x92b   : > { %p2995_p12 = scmp.lt.u32.totalorder %s2993_s24, %s2989_s16  ;;  %p2997_p0 = scmp.lt.u32.totalorder %s2989_s16, %s3664_s15 }
 0x92c   : > { %p2991_p6 = pnand %p2990_p4, %p3792_p5 }
 0x92d   : > { %p2996_p11 = por %p2995_p12, %p2994_p1 }
 0x92e   : > { %p2992_p3 = pneg %p2991_p6 }
 0x92f   : > { %p2998_p7 = por %p2997_p0, %p2996_p11 }
 0x931   : > { %p2999_p10 = pnand %p2998_p7, %p2992_p3 }
 0x933   : > { %3002 = shalt.err (!%p2999_p10)
}
 0x934   : > { %2620 = dma.vmem_to_hbm [thread:$0]  (%p3792_p5), %s3666_s18, 128, %s3664_s15, %s2069_s30  }
 0x935 PF: > { %s2095_s6 = sand.u32 1, %s3049_s27   ;;  %p3793_p13 = scmp.ne.s32.totalorder %s3773_s3, 0 }
 0x936   : > { %p3794_p2 = scmp.ge.s32.totalorder %s3069_s19, 2  ;;  %s2096_s9 = scalar_lea.sflag [#allocation5], %s2095_s6 }
 0x938   : > { %p2646_p8 = pnand %p3794_p2, %p3793_p13 }
 0x93a   : > { %3044 = dma.done.wait (!%p2646_p8), %s2096_s9, 128  }
 0x93b   : > { %3046 = vsyncadd (!%p2646_p8), %s2096_s9, 4294967168  ;;  %s37_s19 = sadd.s32 1, %s3069_s19   ;;  %s3795_s27 = smov %s3053_s28 }
 0x93c   : > { %p34_p9 = scmp.ge.s32.totalorder %s37_s19, 4   ;;  %s3796_s28 = smov %s3057_s29 }
 0x93d   : > { %s3797_s29 = smov %s3401_s8  ;;  %s3798_s30 = smov %s3065_s0 }
 0x93e   : > { %s3799_s0 = smov %s3801_s23  ;;  %36 = sbr.rel (!%p34_p9) target bundleno = 26 (0x1a), region = 167 }
 0x945   :  { %2101 = vsyncpa [#allocation4], 1 }
 0x946   :  { %2103 = vsyncpa [#allocation4 + $0x1], 1 }
 0x947   :  { %2104 = vsyncpa [#allocation7], 1 }
 0x948   :  { %2105 = vsyncpa [#allocation10], 1 }
 0x949   :  { %2106 = vsyncpa [#allocation13], 1 }
 0x94a   :  { %2107 = vsyncpa [#allocation5], 1 }
 0x94b   :  { %2109 = vsyncpa [#allocation5 + $0x1], 1 }

</bundles_post_ra>
